<compile_context>
chip_gen: v5e
topology: v5e:2x2
jax: 0.10.0
libtpu: 0.0.40
codegen_flags: <defaults>
</compile_context>

<pallas_src>
import jax
import jax.numpy as jnp
from jax import lax
from jax.experimental import pallas as pl
from jax.experimental.pallas import tpu as pltpu


def _select_cols(x, feats):
    return jnp.take(x, jnp.asarray(feats, dtype=jnp.int32), axis=1)


# ------------------------------- Pallas forward ------------------------------ #
def add_encoder_forward(x_user, x_item, x_context, user_hist, hist_len, klg,
                        params, cfg, *, bm=256):
    """Forward pass matching AddEncoder.forward (eval mode)."""
    del user_hist, hist_len, klg            # unused by AddEncoder.forward

    user_feats = tuple(cfg["klg_user_feats"])
    item_feats = tuple(cfg["klg_item_feats"])
    ctx_feats = tuple(cfg["klg_context_feats"])
    nu, ni, nc = len(user_feats), len(item_feats), len(ctx_feats)
    nui = nu + ni
    nk = nu * ni * nc

    emb = params["emb_table"].astype(jnp.float32)
    vocab, d = emb.shape
    h1_dim = params["w1"].shape[1]
    h2_dim = params["w2"].shape[1]
    kvec = params["w3"].shape[1]

    B = x_user.shape[0]
    n_tiles = pl.cdiv(B, bm)                # pad tail instead of silently dropping it
    bp = n_tiles * bm

    # ---- index plumbing (tiny int32 arrays only — the heavy embedding gather is in-kernel):
    #      (B, nf) klg indices -> (nf, Bp) with the batch on the 128-lane axis.
    def prep_idx(cols):
        x = jnp.pad(cols.astype(jnp.int32), ((0, bp - B), (0, 0)))
        return x.T                                                  # (nf, Bp)

    idx_ui = prep_idx(jnp.concatenate([_select_cols(x_user, user_feats),
                                       _select_cols(x_item, item_feats)], axis=1))
    idx_c = prep_idx(_select_cols(x_context, ctx_feats))

    # ---- weights, transposed to (out_features, in_features); all VMEM-resident
    emb_t = emb.T                                                   # (D, V)
    w1 = params["w1"].astype(jnp.float32)                           # (2D, H1)
    w1a_t = w1[:d].T                                                # (H1, D)  user+item half
    w1b_t = w1[d:].T                                                # (H1, D)  context half
    b1_c = params["b1"].reshape(h1_dim, 1).astype(jnp.float32)
    w2_t = params["w2"].T.astype(jnp.float32)                       # (H2, H1)
    b2_c = params["b2"].reshape(h2_dim, 1).astype(jnp.float32)
    w3_t = params["w3"].T.astype(jnp.float32)                       # (Kvec, H2)
    b3_c = params["b3"].reshape(kvec, 1).astype(jnp.float32)
    # final Linear(Nk*Kvec -> 1): pre-broadcast each of the Nk columns over its bm-lane block
    # so the kernel applies it as one elementwise multiply (PyTorch flattens with Kvec fastest).
    wlin_wide = jnp.repeat(params["w_lin"].reshape(nk, kvec).T.astype(jnp.float32),
                           bm, axis=1)                              # (Kvec, Nk*bm)
    blin = params["b_lin"].reshape(1).astype(jnp.float32)           # scalar -> SMEM

    def kernel(ui_idx_ref, c_idx_ref, emb_ref, w1a_ref, w1b_ref, b1_ref,
               w2_ref, b2_ref, w3_ref, b3_ref, wlin_ref, blin_ref, out_ref):
        emb_t_v = emb_ref[...]                                      # (D, V) resident table
        iota_v = lax.broadcasted_iota(jnp.int32, (vocab, bm), 0)    # hoisted, reused per field

        def gather_lane_stacked(idx_ref, nf):
            # fused embedding gather via one-hot matmul; fields stacked on the lane axis
            oh = jnp.concatenate(
                [(iota_v == idx_ref[f:f + 1, :]).astype(jnp.float32) for f in range(nf)],
                axis=1)                                             # (V, nf*bm)
            return jnp.dot(emb_t_v, oh, preferred_element_type=jnp.float32)   # (D, nf*bm)

        x_ui = gather_lane_stacked(ui_idx_ref, nui)                 # (D, (nu+ni)*bm)
        x_c = gather_lane_stacked(c_idx_ref, nc)                    # (D, nc*bm)

        # layer 1: two wide dots (all user+item fields in one, all context fields in one)
        ui_proj = jnp.dot(w1a_ref[...], x_ui,
                          preferred_element_type=jnp.float32)       # (H1, (nu+ni)*bm)
        c_proj = jnp.dot(w1b_ref[...], x_c,
                         preferred_element_type=jnp.float32) + b1_ref[...]    # (H1, nc*bm)

        # assemble all Nk = nu*ni*nc crossed triples on the lane axis (128-aligned slices are
        # free), then run layers 2/3 as single wide dots over Nk*bm lanes
        blocks = []
        for u in range(nu):
            up = ui_proj[:, u * bm:(u + 1) * bm]
            for i in range(ni):
                ip = ui_proj[:, (nu + i) * bm:(nu + i + 1) * bm]
                for c in range(nc):
                    cp = c_proj[:, c * bm:(c + 1) * bm]
                    blocks.append(jnp.maximum(up + ip + cp, 0.0))   # (H1, bm)
        h1_all = jnp.concatenate(blocks, axis=1)                    # (H1, Nk*bm)

        h2_all = jnp.maximum(
            jnp.dot(w2_ref[...], h1_all, preferred_element_type=jnp.float32) + b2_ref[...],
            0.0)                                                    # (H2, Nk*bm)
        v_all = jnp.maximum(
            jnp.dot(w3_ref[...], h2_all, preferred_element_type=jnp.float32) + b3_ref[...],
            0.0)                                                    # (Kvec, Nk*bm)

        # final Linear(Nk*Kvec -> 1): elementwise mul + Nk block adds + sublane reduction
        s = v_all * wlin_ref[...]                                   # (Kvec, Nk*bm)
        acc = s[:, 0:bm]
        for k in range(1, nk):
            acc = acc + s[:, k * bm:(k + 1) * bm]                   # (Kvec, bm)
        logit = jnp.sum(acc, axis=0, keepdims=True) + blin_ref[0]   # (1, bm) lane-dense
        out_ref[...] = jax.nn.sigmoid(logit)

    tiled = lambda rows: pl.BlockSpec((rows, bm), lambda i: (0, i))  # batch-tiled index streams
    full = lambda shape: pl.BlockSpec(shape, lambda i: (0, 0))       # resident weights/table

    out = pl.pallas_call(
        kernel,
        out_shape=jax.ShapeDtypeStruct((1, bp), jnp.float32),
        grid_spec=pltpu.PrefetchScalarGridSpec(
            num_scalar_prefetch=0,
            grid=(n_tiles,),
            in_specs=[
                tiled(nui), tiled(nc),
                full((d, vocab)),
                full((h1_dim, d)), full((h1_dim, d)), full((h1_dim, 1)),
                full((h2_dim, h1_dim)), full((h2_dim, 1)),
                full((kvec, h2_dim)), full((kvec, 1)),
                full((kvec, nk * bm)),
                pl.BlockSpec(memory_space=pltpu.MemorySpace.SMEM),   # scalar linear bias
            ],
            out_specs=pl.BlockSpec((1, bm), lambda i: (0, i)),
        ),
        compiler_params=pltpu.CompilerParams(
            dimension_semantics=("parallel",)),
    )(idx_ui, idx_c, emb_t, w1a_t, w1b_t, b1_c, w2_t, b2_c, w3_t, b3_c,
      wlin_wide, blin)

    return out[0, :B]                       # sigmoid(pred.squeeze(1))


# ----------------------------- pure-JAX reference ---------------------------- #
def add_encoder_reference(x_user, x_item, x_context, params, cfg):
    hp = jax.lax.Precision.HIGHEST          # full-f32 truth; kernel runs at default precision
    emb = params["emb_table"]
    d = emb.shape[1]
    ue = jnp.take(emb, _select_cols(x_user, cfg["klg_user_feats"]), axis=0)     # (B,Nu,D)
    ie = jnp.take(emb, _select_cols(x_item, cfg["klg_item_feats"]), axis=0)     # (B,Ni,D)
    ce = jnp.take(emb, _select_cols(x_context, cfg["klg_context_feats"]), axis=0)
    B, nu, _ = ue.shape
    ni, nc = ie.shape[1], ce.shape[1]

    # assumed UICCrossLayer: concat(user + item, context) for every (u, i, c) triple
    add_ui = ue[:, :, None, :] + ie[:, None, :, :]                              # (B,Nu,Ni,D)
    p1 = jnp.broadcast_to(add_ui[:, :, :, None, :], (B, nu, ni, nc, d))
    p2 = jnp.broadcast_to(ce[:, None, None, :, :], (B, nu, ni, nc, d))
    cross = jnp.concatenate([p1, p2], axis=-1).reshape(B, nu * ni * nc, 2 * d)

    h = jnp.maximum(jnp.matmul(cross, params["w1"], precision=hp) + params["b1"], 0.0)
    h = jnp.maximum(jnp.matmul(h, params["w2"], precision=hp) + params["b2"], 0.0)
    h = jnp.maximum(jnp.matmul(h, params["w3"], precision=hp) + params["b3"], 0.0)
    logit = jnp.matmul(h.reshape(B, -1), params["w_lin"], precision=hp) + params["b_lin"]
    return jax.nn.sigmoid(logit[:, 0])


# ------------------------------------ main ----------------------------------- #
if __name__ == "__main__":
    # small config consistent with the module; batch 512 -> two 256-lane tiles (keeps both
    # v7x TensorCores busy while filling the 256-wide MXU on v6e/v7x)
    vocab_size = 200
    user_nf, item_nf, ctx_nf = 3, 3, 2
    cfg = dict(klg_user_feats=(0, 2), klg_item_feats=(1, 2), klg_context_feats=(0,))
    embed_dim = 16
    hidden_dims = (64, 32)
    klg_encoder_vec_dim = 8
    B = 512

    nu, ni, nc = len(cfg["klg_user_feats"]), len(cfg["klg_item_feats"]), len(cfg["klg_context_feats"])
    nk = nu * ni * nc                       # klg_num_fields (klg_has_hist = False)
    h1, h2 = hidden_dims

    key = jax.random.PRNGKey(0)
    ks = jax.random.split(key, 16)
    rnd = lambda k, shape, s=0.2: s * jax.random.normal(k, shape, jnp.float32)

    params = {
        "emb_table": rnd(ks[0], (vocab_size, embed_dim), 0.3),
        # encoder = MLP(2*D, hidden_dims + [kvec], batch_norm=False): Linear+ReLU x 3
        "w1": rnd(ks[1], (2 * embed_dim, h1)),
        "b1": rnd(ks[2], (h1,), 0.05),
        "w2": rnd(ks[3], (h1, h2)),
        "b2": rnd(ks[4], (h2,), 0.05),
        "w3": rnd(ks[5], (h2, klg_encoder_vec_dim)),
        "b3": rnd(ks[6], (klg_encoder_vec_dim,), 0.05),
        # self.linear = Linear(klg_num_fields * klg_encoder_vec_dim, 1)
        "w_lin": rnd(ks[7], (nk * klg_encoder_vec_dim, 1)),
        "b_lin": rnd(ks[8], (1,), 0.05),
    }

    x_user = jax.random.randint(ks[9], (B, user_nf), 0, vocab_size, jnp.int32)
    x_item = jax.random.randint(ks[10], (B, item_nf), 0, vocab_size, jnp.int32)
    x_context = jax.random.randint(ks[11], (B, ctx_nf), 0, vocab_size, jnp.int32)
    user_hist = jax.random.randint(ks[12], (B, 4), 0, vocab_size, jnp.int32)        # unused
    hist_len = jnp.full((B,), 4, jnp.int32)                                          # unused
    klg = jax.random.normal(ks[13], (B, nk * klg_encoder_vec_dim), jnp.float32)      # unused

    out = add_encoder_forward(x_user, x_item, x_context, user_hist, hist_len, klg,
                              params, cfg, bm=256)
    out = jax.block_until_ready(out)

    ref = jax.block_until_ready(add_encoder_reference(x_user, x_item, x_context, params, cfg))
    assert out.shape == (B,)
    # kernel dots run at default (bf16-pass, f32-accumulate) MXU precision; reference is full f32
    err = float(jnp.max(jnp.abs(out - ref)))
    assert jnp.allclose(out, ref, atol=5e-3, rtol=5e-3), f"max abs err {err}"

    print("KERNEL_OK")
</pallas_src>

<mosaic_0001>
module attributes {stable_mosaic.version = 11 : i64} {
  func.func @kernel(%arg0: i32, %arg1: memref<4x256xi32, #tpu.memory_space<vmem>>, %arg2: memref<1x256xi32, #tpu.memory_space<vmem>>, %arg3: memref<16x200xf32, #tpu.memory_space<vmem>>, %arg4: memref<64x16xf32, #tpu.memory_space<vmem>>, %arg5: memref<64x16xf32, #tpu.memory_space<vmem>>, %arg6: memref<64x1xf32, #tpu.memory_space<vmem>>, %arg7: memref<32x64xf32, #tpu.memory_space<vmem>>, %arg8: memref<32x1xf32, #tpu.memory_space<vmem>>, %arg9: memref<8x32xf32, #tpu.memory_space<vmem>>, %arg10: memref<8x1xf32, #tpu.memory_space<vmem>>, %arg11: memref<8x1024xf32, #tpu.memory_space<vmem>>, %arg12: memref<1xf32, #tpu.memory_space<smem>>, %arg13: memref<1x256xf32, #tpu.memory_space<vmem>>) attributes {dimension_semantics = [#tpu.dimension_semantics<parallel>], iteration_bounds = array<i64: 2>, scalar_prefetch = 0 : i64, scratch_operands = 0 : i64, tpu.core_type = #tpu.core_type<tc>, window_params = [{transform_indices = @transform_0, window_bounds = array<i64: 4, 256>}, {transform_indices = @transform_1, window_bounds = array<i64: 1, 256>}, {pipeline_mode = #tpu.pipeline_mode<synchronous>, transform_indices = @transform_2, window_bounds = array<i64: 16, 200>}, {pipeline_mode = #tpu.pipeline_mode<synchronous>, transform_indices = @transform_3, window_bounds = array<i64: 64, 16>}, {pipeline_mode = #tpu.pipeline_mode<synchronous>, transform_indices = @transform_4, window_bounds = array<i64: 64, 16>}, {pipeline_mode = #tpu.pipeline_mode<synchronous>, transform_indices = @transform_5, window_bounds = array<i64: 64, 1>}, {pipeline_mode = #tpu.pipeline_mode<synchronous>, transform_indices = @transform_6, window_bounds = array<i64: 32, 64>}, {pipeline_mode = #tpu.pipeline_mode<synchronous>, transform_indices = @transform_7, window_bounds = array<i64: 32, 1>}, {pipeline_mode = #tpu.pipeline_mode<synchronous>, transform_indices = @transform_8, window_bounds = array<i64: 8, 32>}, {pipeline_mode = #tpu.pipeline_mode<synchronous>, transform_indices = @transform_9, window_bounds = array<i64: 8, 1>}, {pipeline_mode = #tpu.pipeline_mode<synchronous>, transform_indices = @transform_10, window_bounds = array<i64: 8, 1024>}, {transform_indices = @transform_11, window_bounds = array<i64: 1>}, {transform_indices = @transform_12, window_bounds = array<i64: 1, 256>}]} {
    %c0 = arith.constant 0 : index
    %c0_0 = arith.constant 0 : index
    %0 = vector.load %arg3[%c0, %c0_0] : memref<16x200xf32, #tpu.memory_space<vmem>>, vector<16x200xf32>
    %1 = tpu.iota {dimensions = array<i32: 0>} : vector<200x256xi32>
    %c0_1 = arith.constant 0 : index
    %c0_2 = arith.constant 0 : index
    %2 = vector.load %arg1[%c0_1, %c0_2] : memref<4x256xi32, #tpu.memory_space<vmem>>, vector<1x256xi32>
    %3 = vector.broadcast %2 : vector<1x256xi32> to vector<200x256xi32>
    %4 = arith.cmpi eq, %1, %3 : vector<200x256xi32>
    %5 = arith.extui %4 : vector<200x256xi1> to vector<200x256xi32>
    %6 = arith.sitofp %5 : vector<200x256xi32> to vector<200x256xf32>
    %c1 = arith.constant 1 : index
    %c0_3 = arith.constant 0 : index
    %7 = vector.load %arg1[%c1, %c0_3] : memref<4x256xi32, #tpu.memory_space<vmem>>, vector<1x256xi32>
    %8 = vector.broadcast %7 : vector<1x256xi32> to vector<200x256xi32>
    %9 = arith.cmpi eq, %1, %8 : vector<200x256xi32>
    %10 = arith.extui %9 : vector<200x256xi1> to vector<200x256xi32>
    %11 = arith.sitofp %10 : vector<200x256xi32> to vector<200x256xf32>
    %c2 = arith.constant 2 : index
    %c0_4 = arith.constant 0 : index
    %12 = vector.load %arg1[%c2, %c0_4] : memref<4x256xi32, #tpu.memory_space<vmem>>, vector<1x256xi32>
    %13 = vector.broadcast %12 : vector<1x256xi32> to vector<200x256xi32>
    %14 = arith.cmpi eq, %1, %13 : vector<200x256xi32>
    %15 = arith.extui %14 : vector<200x256xi1> to vector<200x256xi32>
    %16 = arith.sitofp %15 : vector<200x256xi32> to vector<200x256xf32>
    %c3 = arith.constant 3 : index
    %c0_5 = arith.constant 0 : index
    %17 = vector.load %arg1[%c3, %c0_5] : memref<4x256xi32, #tpu.memory_space<vmem>>, vector<1x256xi32>
    %18 = vector.broadcast %17 : vector<1x256xi32> to vector<200x256xi32>
    %19 = arith.cmpi eq, %1, %18 : vector<200x256xi32>
    %20 = arith.extui %19 : vector<200x256xi1> to vector<200x256xi32>
    %21 = arith.sitofp %20 : vector<200x256xi32> to vector<200x256xf32>
    %22 = tpu.concatenate %6, %11, %16, %21 in 1 : vector<200x256xf32>, vector<200x256xf32>, vector<200x256xf32>, vector<200x256xf32> -> vector<200x1024xf32>
    %cst = arith.constant dense<0.000000e+00> : vector<16x1024xf32>
    %23 = tpu.matmul %0, %22, %cst {dimension_numbers = #tpu.dot_dimension_numbers<[1], [0], [0], [1], [0, 0, 1, 1], [], []>} : vector<16x200xf32>, vector<200x1024xf32>, vector<16x1024xf32> -> vector<16x1024xf32>
    %c0_6 = arith.constant 0 : index
    %c0_7 = arith.constant 0 : index
    %24 = vector.load %arg2[%c0_6, %c0_7] : memref<1x256xi32, #tpu.memory_space<vmem>>, vector<1x256xi32>
    %25 = vector.broadcast %24 : vector<1x256xi32> to vector<200x256xi32>
    %26 = arith.cmpi eq, %1, %25 : vector<200x256xi32>
    %27 = arith.extui %26 : vector<200x256xi1> to vector<200x256xi32>
    %28 = arith.sitofp %27 : vector<200x256xi32> to vector<200x256xf32>
    %cst_8 = arith.constant dense<0.000000e+00> : vector<16x256xf32>
    %29 = tpu.matmul %0, %28, %cst_8 {dimension_numbers = #tpu.dot_dimension_numbers<[1], [0], [0], [1], [0, 0, 1, 1], [], []>} : vector<16x200xf32>, vector<200x256xf32>, vector<16x256xf32> -> vector<16x256xf32>
    %c0_9 = arith.constant 0 : index
    %c0_10 = arith.constant 0 : index
    %30 = vector.load %arg4[%c0_9, %c0_10] : memref<64x16xf32, #tpu.memory_space<vmem>>, vector<64x16xf32>
    %cst_11 = arith.constant dense<0.000000e+00> : vector<64x1024xf32>
    %31 = tpu.matmul %30, %23, %cst_11 {dimension_numbers = #tpu.dot_dimension_numbers<[1], [0], [0], [1], [0, 0, 1, 1], [], []>} : vector<64x16xf32>, vector<16x1024xf32>, vector<64x1024xf32> -> vector<64x1024xf32>
    %c0_12 = arith.constant 0 : index
    %c0_13 = arith.constant 0 : index
    %32 = vector.load %arg5[%c0_12, %c0_13] : memref<64x16xf32, #tpu.memory_space<vmem>>, vector<64x16xf32>
    %cst_14 = arith.constant dense<0.000000e+00> : vector<64x256xf32>
    %33 = tpu.matmul %32, %29, %cst_14 {dimension_numbers = #tpu.dot_dimension_numbers<[1], [0], [0], [1], [0, 0, 1, 1], [], []>} : vector<64x16xf32>, vector<16x256xf32>, vector<64x256xf32> -> vector<64x256xf32>
    %c0_15 = arith.constant 0 : index
    %c0_16 = arith.constant 0 : index
    %34 = vector.load %arg6[%c0_15, %c0_16] : memref<64x1xf32, #tpu.memory_space<vmem>>, vector<64x1xf32>
    %35 = vector.broadcast %34 : vector<64x1xf32> to vector<64x256xf32>
    %36 = arith.addf %33, %35 : vector<64x256xf32>
    %37 = vector.extract_strided_slice %31 {offsets = [0, 0], sizes = [64, 256], strides = [1, 1]} : vector<64x1024xf32> to vector<64x256xf32>
    %38 = vector.extract_strided_slice %31 {offsets = [0, 512], sizes = [64, 256], strides = [1, 1]} : vector<64x1024xf32> to vector<64x256xf32>
    %39 = arith.addf %37, %38 : vector<64x256xf32>
    %40 = arith.addf %39, %36 : vector<64x256xf32>
    %cst_17 = arith.constant 0.000000e+00 : f32
    %41 = vector.broadcast %cst_17 : f32 to vector<64x256xf32>
    %42 = arith.maximumf %40, %41 : vector<64x256xf32>
    %43 = vector.extract_strided_slice %31 {offsets = [0, 768], sizes = [64, 256], strides = [1, 1]} : vector<64x1024xf32> to vector<64x256xf32>
    %44 = arith.addf %37, %43 : vector<64x256xf32>
    %45 = arith.addf %44, %36 : vector<64x256xf32>
    %cst_18 = arith.constant 0.000000e+00 : f32
    %46 = vector.broadcast %cst_18 : f32 to vector<64x256xf32>
    %47 = arith.maximumf %45, %46 : vector<64x256xf32>
    %48 = vector.extract_strided_slice %31 {offsets = [0, 256], sizes = [64, 256], strides = [1, 1]} : vector<64x1024xf32> to vector<64x256xf32>
    %49 = vector.extract_strided_slice %31 {offsets = [0, 512], sizes = [64, 256], strides = [1, 1]} : vector<64x1024xf32> to vector<64x256xf32>
    %50 = arith.addf %48, %49 : vector<64x256xf32>
    %51 = arith.addf %50, %36 : vector<64x256xf32>
    %cst_19 = arith.constant 0.000000e+00 : f32
    %52 = vector.broadcast %cst_19 : f32 to vector<64x256xf32>
    %53 = arith.maximumf %51, %52 : vector<64x256xf32>
    %54 = vector.extract_strided_slice %31 {offsets = [0, 768], sizes = [64, 256], strides = [1, 1]} : vector<64x1024xf32> to vector<64x256xf32>
    %55 = arith.addf %48, %54 : vector<64x256xf32>
    %56 = arith.addf %55, %36 : vector<64x256xf32>
    %cst_20 = arith.constant 0.000000e+00 : f32
    %57 = vector.broadcast %cst_20 : f32 to vector<64x256xf32>
    %58 = arith.maximumf %56, %57 : vector<64x256xf32>
    %59 = tpu.concatenate %42, %47, %53, %58 in 1 : vector<64x256xf32>, vector<64x256xf32>, vector<64x256xf32>, vector<64x256xf32> -> vector<64x1024xf32>
    %c0_21 = arith.constant 0 : index
    %c0_22 = arith.constant 0 : index
    %60 = vector.load %arg7[%c0_21, %c0_22] : memref<32x64xf32, #tpu.memory_space<vmem>>, vector<32x64xf32>
    %cst_23 = arith.constant dense<0.000000e+00> : vector<32x1024xf32>
    %61 = tpu.matmul %60, %59, %cst_23 {dimension_numbers = #tpu.dot_dimension_numbers<[1], [0], [0], [1], [0, 0, 1, 1], [], []>} : vector<32x64xf32>, vector<64x1024xf32>, vector<32x1024xf32> -> vector<32x1024xf32>
    %c0_24 = arith.constant 0 : index
    %c0_25 = arith.constant 0 : index
    %62 = vector.load %arg8[%c0_24, %c0_25] : memref<32x1xf32, #tpu.memory_space<vmem>>, vector<32x1xf32>
    %63 = vector.broadcast %62 : vector<32x1xf32> to vector<32x1024xf32>
    %64 = arith.addf %61, %63 : vector<32x1024xf32>
    %cst_26 = arith.constant 0.000000e+00 : f32
    %65 = vector.broadcast %cst_26 : f32 to vector<32x1024xf32>
    %66 = arith.maximumf %64, %65 : vector<32x1024xf32>
    %c0_27 = arith.constant 0 : index
    %c0_28 = arith.constant 0 : index
    %67 = vector.load %arg9[%c0_27, %c0_28] : memref<8x32xf32, #tpu.memory_space<vmem>>, vector<8x32xf32>
    %cst_29 = arith.constant dense<0.000000e+00> : vector<8x1024xf32>
    %68 = tpu.matmul %67, %66, %cst_29 {dimension_numbers = #tpu.dot_dimension_numbers<[1], [0], [0], [1], [0, 0, 1, 1], [], []>} : vector<8x32xf32>, vector<32x1024xf32>, vector<8x1024xf32> -> vector<8x1024xf32>
    %c0_30 = arith.constant 0 : index
    %c0_31 = arith.constant 0 : index
    %69 = vector.load %arg10[%c0_30, %c0_31] : memref<8x1xf32, #tpu.memory_space<vmem>>, vector<8x1xf32>
    %70 = vector.broadcast %69 : vector<8x1xf32> to vector<8x1024xf32>
    %71 = arith.addf %68, %70 : vector<8x1024xf32>
    %cst_32 = arith.constant 0.000000e+00 : f32
    %72 = vector.broadcast %cst_32 : f32 to vector<8x1024xf32>
    %73 = arith.maximumf %71, %72 : vector<8x1024xf32>
    %c0_33 = arith.constant 0 : index
    %c0_34 = arith.constant 0 : index
    %74 = vector.load %arg11[%c0_33, %c0_34] : memref<8x1024xf32, #tpu.memory_space<vmem>>, vector<8x1024xf32>
    %75 = arith.mulf %73, %74 : vector<8x1024xf32>
    %76 = vector.extract_strided_slice %75 {offsets = [0, 0], sizes = [8, 256], strides = [1, 1]} : vector<8x1024xf32> to vector<8x256xf32>
    %77 = vector.extract_strided_slice %75 {offsets = [0, 256], sizes = [8, 256], strides = [1, 1]} : vector<8x1024xf32> to vector<8x256xf32>
    %78 = arith.addf %76, %77 : vector<8x256xf32>
    %79 = vector.extract_strided_slice %75 {offsets = [0, 512], sizes = [8, 256], strides = [1, 1]} : vector<8x1024xf32> to vector<8x256xf32>
    %80 = arith.addf %78, %79 : vector<8x256xf32>
    %81 = vector.extract_strided_slice %75 {offsets = [0, 768], sizes = [8, 256], strides = [1, 1]} : vector<8x1024xf32> to vector<8x256xf32>
    %82 = arith.addf %80, %81 : vector<8x256xf32>
    %cst_35 = arith.constant dense<0.000000e+00> : vector<256xf32>
    %83 = vector.multi_reduction <add>, %82, %cst_35 [0] : vector<8x256xf32> to vector<256xf32>
    %84 = vector.shape_cast %83 : vector<256xf32> to vector<1x256xf32>
    %c0_36 = arith.constant 0 : index
    %85 = memref.load %arg12[%c0_36] : memref<1xf32, #tpu.memory_space<smem>>
    %86 = vector.broadcast %85 : f32 to vector<1x256xf32>
    %87 = arith.addf %84, %86 : vector<1x256xf32>
    %88 = arith.negf %87 : vector<1x256xf32>
    %89 = math.exp %88 : vector<1x256xf32>
    %cst_37 = arith.constant 1.000000e+00 : f32
    %90 = vector.broadcast %cst_37 : f32 to vector<1x256xf32>
    %91 = arith.addf %90, %89 : vector<1x256xf32>
    %92 = arith.divf %90, %91 : vector<1x256xf32>
    %c0_38 = arith.constant 0 : index
    %c0_39 = arith.constant 0 : index
    %93 = vector.load %arg13[%c0_38, %c0_39] : memref<1x256xf32, #tpu.memory_space<vmem>>, vector<1x256xf32>
    tpu.vector_store %arg13[%c0_38, %c0_39], %92 {strides = array<i32>} : memref<1x256xf32, #tpu.memory_space<vmem>>, vector<1x256xf32>,
    return
  }
  func.func @transform_0(%arg0: i32) -> (i32, i32) {
    %c0_i32 = arith.constant 0 : i32
    %c0_i32_0 = arith.constant 0 : i32
    return %c0_i32, %arg0 : i32, i32
  }
  func.func @transform_1(%arg0: i32) -> (i32, i32) {
    %c0_i32 = arith.constant 0 : i32
    %c0_i32_0 = arith.constant 0 : i32
    return %c0_i32, %arg0 : i32, i32
  }
  func.func @transform_2(%arg0: i32) -> (i32, i32) {
    %c0_i32 = arith.constant 0 : i32
    %c0_i32_0 = arith.constant 0 : i32
    %c0_i32_1 = arith.constant 0 : i32
    return %c0_i32, %c0_i32_0 : i32, i32
  }
  func.func @transform_3(%arg0: i32) -> (i32, i32) {
    %c0_i32 = arith.constant 0 : i32
    %c0_i32_0 = arith.constant 0 : i32
    %c0_i32_1 = arith.constant 0 : i32
    return %c0_i32, %c0_i32_0 : i32, i32
  }
  func.func @transform_4(%arg0: i32) -> (i32, i32) {
    %c0_i32 = arith.constant 0 : i32
    %c0_i32_0 = arith.constant 0 : i32
    %c0_i32_1 = arith.constant 0 : i32
    return %c0_i32, %c0_i32_0 : i32, i32
  }
  func.func @transform_5(%arg0: i32) -> (i32, i32) {
    %c0_i32 = arith.constant 0 : i32
    %c0_i32_0 = arith.constant 0 : i32
    %c0_i32_1 = arith.constant 0 : i32
    return %c0_i32, %c0_i32_0 : i32, i32
  }
  func.func @transform_6(%arg0: i32) -> (i32, i32) {
    %c0_i32 = arith.constant 0 : i32
    %c0_i32_0 = arith.constant 0 : i32
    %c0_i32_1 = arith.constant 0 : i32
    return %c0_i32, %c0_i32_0 : i32, i32
  }
  func.func @transform_7(%arg0: i32) -> (i32, i32) {
    %c0_i32 = arith.constant 0 : i32
    %c0_i32_0 = arith.constant 0 : i32
    %c0_i32_1 = arith.constant 0 : i32
    return %c0_i32, %c0_i32_0 : i32, i32
  }
  func.func @transform_8(%arg0: i32) -> (i32, i32) {
    %c0_i32 = arith.constant 0 : i32
    %c0_i32_0 = arith.constant 0 : i32
    %c0_i32_1 = arith.constant 0 : i32
    return %c0_i32, %c0_i32_0 : i32, i32
  }
  func.func @transform_9(%arg0: i32) -> (i32, i32) {
    %c0_i32 = arith.constant 0 : i32
    %c0_i32_0 = arith.constant 0 : i32
    %c0_i32_1 = arith.constant 0 : i32
    return %c0_i32, %c0_i32_0 : i32, i32
  }
  func.func @transform_10(%arg0: i32) -> (i32, i32) {
    %c0_i32 = arith.constant 0 : i32
    %c0_i32_0 = arith.constant 0 : i32
    %c0_i32_1 = arith.constant 0 : i32
    return %c0_i32, %c0_i32_0 : i32, i32
  }
  func.func @transform_11(%arg0: i32) -> i32 {
    %c0_i32 = arith.constant 0 : i32
    %c0_i32_0 = arith.constant 0 : i32
    return %c0_i32 : i32
  }
  func.func @transform_12(%arg0: i32) -> (i32, i32) {
    %c0_i32 = arith.constant 0 : i32
    %c0_i32_0 = arith.constant 0 : i32
    return %c0_i32, %arg0 : i32, i32
  }
}

</mosaic_0001>

<bundles_post_ra>
// kernel: tpu_custom_call.1
= control target key start
LH: loop header
LB: loop body
LE: loop exit
PB: predicated region body
PF: predicated region fallthrough
CT: control target
= control target key end

     0   :  { %s5779_s0 = inlined_call_operand.vmem [shape: s32[4,512], index: 0, kind: input, shape index: {}]   ;;  %s5780_s1 = inlined_call_operand.vmem [shape: s32[1,512], index: 1, kind: input, shape index: {}]   ;;  %s5781_s2 = inlined_call_operand.vmem [shape: f32[16,200], index: 2, kind: input, shape index: {}]   ;;  %s5782_s3 = inlined_call_operand.vmem [shape: f32[64,16], index: 3, kind: input, shape index: {}]   ;;  %s5783_s4 = inlined_call_operand.vmem [shape: f32[64,16], index: 4, kind: input, shape index: {}]   ;;  %s5784_s5 = inlined_call_operand.vmem [shape: f32[64,1], index: 5, kind: input, shape index: {}]   ;;  %s5785_s6 = inlined_call_operand.vmem [shape: f32[32,64], index: 6, kind: input, shape index: {}]   ;;  %s5786_s7 = inlined_call_operand.vmem [shape: f32[32,1], index: 7, kind: input, shape index: {}]   ;;  %s5787_s8 = inlined_call_operand.vmem [shape: f32[8,32], index: 8, kind: input, shape index: {}]   ;;  %s5788_s9 = inlined_call_operand.vmem [shape: f32[8,1], index: 9, kind: input, shape index: {}]   ;;  %s5789_s10 = inlined_call_operand.vmem [shape: f32[8,1024], index: 10, kind: input, shape index: {}]   ;;  %s5790_s11 = inlined_call_operand.<no memory space> [shape: f32[1], index: 11, kind: input, shape index: {}]   ;;  %s5791_s12 = inlined_call_operand.hbm [shape: f32[1,512], index: 12, kind: output, shape index: {}]  }
   0x1   :  { %5817 = sst [smem:[#allocation39_spill]] %s5779_s0 }
   0x2   :  { %17 = sst [smem:[#allocation2]] %s5790_s11 }
   0x3   :  { %18 = vsyncpa [#allocation4], 0 }
   0x4   :  { %20 = vsyncpa [#allocation4 + $0x1], 0  ;;  %s3913_s23 = smov 0   ;;  %s3915_s24 = smov 0  }
   0x5   :  { %s3917_s25 = smov 0   ;;  %s3919_s26 = smov 0  }
   0x6 LB: > { %s3069_s11 = sadd.s32 4294967295, %s3841_s26   ;;  %s3070_s27 = sadd.s32 4294967294, %s3841_s26   ;;  %s3841_s26 = sphi %s3919_s26, %s5893_s26   ;;  %s3837_s25 = sphi %s3917_s25, %s5892_s25   ;;  %s3833_s24 = sphi %s3915_s24, %s5891_s24   ;;  %s3829_s23 = sphi %s3913_s23, %s5890_s23  }
   0x7   : > { %s3936_s28 = sadd.s32 1, %s3841_s26   ;;  %s295_s29 = sadd.s32 1, %s3837_s25 }
   0x8   : > { %s292_s30 = ssub.s32 %s3841_s26, %s3936_s28  ;;  %p305_p0 = scmp.ne.s32.totalorder %s3837_s25, %s3833_s24 }
   0x9   : > { %p293_p1 = scmp.eq.s32.totalorder %s292_s30, 0  ;;  %p306_p2 = scmp.eq.s32.totalorder %s3069_s11, 1 }
   0xa   : > { %p311_p3 = scmp.ne.s32.totalorder %s3833_s24, %s3829_s23  ;;  %p312_p4 = scmp.eq.s32.totalorder %s3070_s27, 1 }
   0xb   : > { %s3946_s13 = scalar_select %p293_p1, %s3837_s25, %s295_s29  }
   0xc   : > { %p3948_p5 = por %p306_p2, %p305_p0  ;;  %p3952_p6 = por %p312_p4, %p311_p3 }
   0xd   : > { %p3073_p7 = scmp.ge.s32.totalorder %s3841_s26, 1  ;;  %p377_p8 = scmp.lt.s32.totalorder %s3841_s26, 3 }
   0xf   : > { %p378_p9 = pnand %p3073_p7, %p377_p8 }
  0x11   : > { %381 = sbr.rel (%p378_p9) target bundleno = 970 (0x3ca), region = 68 }
  0x16   : > { %s3958_s16 = sshll.u32 %s3069_s11, 1  ;;  %v5792_v0 = vlaneseq  ;;  %s5820_s0 = sld [smem:[#allocation39_spill]]  ;;  %v3843_v13 = vmov 1.0   ;;  %v4219_v32 = vld [vmem:[%s5781_s2 + $0x8] sm:$0xff]  ;;  %v4256_v34 = vld [vmem:[%s5781_s2] sm:$0xff]  ;;  %v4290_v35 = vld [vmem:[%s5781_s2 + $0x18] sm:$0xff] }
  0x17   : > { %p424_p10 = scmp.lt.s32.totalorder %s3958_s16, 3  ;;  %v4320_v36 = vld [vmem:[%s5781_s2 + $0x10] sm:$0xff]  ;;  %v4922_v55 = vld [vmem:[%s5782_s3] sm:$0xff]  ;;  %v4929_v61 = vld [vmem:[%s5782_s3 + $0x8] sm:$0xff]  ;;  %s5718_s20 = sld [smem:[#allocation2]] }
  0x18   : > { %v3962_v1 = vshrl.u32 %v5792_v0, 7  ;;  %s420_s19 = sand.u32 1, %s3833_s24   ;;  %s3799_s22 = scalar_lea.hbm %s5791_s12, 4 }
  0x19   : > { %s3965_s17 = scalar_select %p424_p10, %s3958_s16, 3 }
  0x1a   : > { %v3974_v2 = vadd.s32 120, %v3962_v1  ;;  %v3977_v3 = vadd.s32 192, %v3962_v1  ;;  %v3980_v4 = vadd.s32 112, %v3962_v1  ;;  %v3984_v6 = vadd.s32 184, %v3962_v1 }
  0x1b   : > { %s3076_s18 = sshll.u32 %s3965_s17, 2  ;;  %v3991_v9 = vadd.s32 104, %v3962_v1  ;;  %v3994_v10 = vadd.s32 176, %v3962_v1  ;;  %v3997_v11 = vadd.s32 96, %v3962_v1  ;;  %v4000_v12 = vadd.s32 168, %v3962_v1  ;;  %s432_s11 = scalar_lea.vmem %s5780_s1, %s3965_s17 }
  0x1c   : > { %s3971_s21 = scalar_lea.vmem %s5820_s0, %s3076_s18  ;;  %v4022_v14 = vadd.s32 88, %v3962_v1  ;;  %v4025_v15 = vadd.s32 160, %v3962_v1  ;;  %v4032_v16 = vadd.s32 80, %v3962_v1  ;;  %v4042_v17 = vadd.s32 152, %v3962_v1  ;;  %v1455_v43 = vld [vmem:[%s432_s11] sm:$0x3]  ;;  %s2997_s11 = scalar_lea.hbm %s5791_s12, %s3958_s16 }
  0x1d   : > { %v465_v5 = vld [vmem:[%s3971_s21] ss:$4 sm:$0x3]  ;;  %v4057_v18 = vadd.s32 72, %v3962_v1  ;;  %v4060_v19 = vadd.s32 144, %v3962_v1  ;;  %v4075_v20 = vadd.s32 64, %v3962_v1 }
  0x1e   : > { %v3986_v7 = vperm.slane %v465_v5, 0  ;;  %v3988_v8 = vperm.slane %v465_v5, 1  ;;  %v4078_v21 = vadd.s32 136, %v3962_v1  ;;  %v4081_v22 = vld [vmem:[%s3971_s21 + $0x1] ss:$4 sm:$0x3] }
  0x1f   : > { %v4102_v23 = vadd.s32 56, %v3962_v1  ;;  %v4105_v24 = vadd.s32 128, %v3962_v1  ;;  %v4120_v25 = vperm.slane %v4081_v22, 0  ;;  %v4129_v26 = vadd.s32 48, %v3962_v1  ;;  %s3001_s29 = sshll.u32 %s2997_s11, 4  ;;  %s2987_s16 = scalar_lea.sflag [#allocation4], %s420_s19  ;;  %s3002_s29 = int_to_ptr.hbm [resolvable:$true] %s3001_s29 }
  0x20   : > { %vm498_vm0 = vcmp.eq.s32.totalorder %v3974_v2, %v3986_v7  ;;  %vm516_vm1 = vcmp.eq.s32.totalorder %v3977_v3, %v3986_v7  ;;  %vm499_vm2 = vcmp.eq.s32.totalorder %v3974_v2, %v3988_v8  ;;  %vm496_vm3 = vcmp.eq.s32.totalorder %v3980_v4, %v3986_v7  ;;  %v3179_v37 = vld [vmem:[%s3971_s21 + $0x2] ss:$4 sm:$0x3]  ;;  %v3230_v40 = vld [vmem:[%s3971_s21 + $0x3] ss:$4 sm:$0x3] }
  0x21   : > { %3281 = vmatpush.msk.msra.mxu0 %vm498_vm0, %v3843_v13  ;;  %3297 = vmatpush.msk.msra.mxu1 %vm516_vm1, %v3843_v13  ;;  %vm514_vm4 = vcmp.eq.s32.totalorder %v3984_v6, %v3986_v7  ;;  %vm497_vm5 = vcmp.eq.s32.totalorder %v3980_v4, %v3988_v8  ;;  %vm494_vm6 = vcmp.eq.s32.totalorder %v3991_v9, %v3986_v7  ;;  %v4144_v27 = vadd.s32 40, %v3962_v1  ;;  %s3793_s30 = sshra.s32 %s3002_s29, 4  ;;  %s3794_s30 = int_to_ptr.hbm [resolvable:$true] %s3793_s30 }
  0x22   : > { %3308 = vmatpush.msk.msra.mxu2 %vm499_vm2, %v3843_v13  ;;  %vm512_vm7 = vcmp.eq.s32.totalorder %v3994_v10, %v3986_v7  ;;  %vm495_vm8 = vcmp.eq.s32.totalorder %v3991_v9, %v3988_v8  ;;  %vm492_vm9 = vcmp.eq.s32.totalorder %v3997_v11, %v3986_v7  ;;  %vm510_vm10 = vcmp.eq.s32.totalorder %v4000_v12, %v3986_v7  ;;  %s3795_s18 = scalar_lea.hbm %s3794_s30, 2  ;;  %p3800_p0 = scmp.lt.s32.totalorder %s3794_s30, %s5791_s12 }
  0x23   : > { %3282 = vmatpush.msk.msra.mxu0 %vm496_vm3, %v3843_v13  ;;  %3298 = vmatpush.msk.msra.mxu1 %vm514_vm4, %v3843_v13  ;;  %vm517_vm11 = vcmp.eq.s32.totalorder %v3977_v3, %v3988_v8  ;;  %vm493_vm12 = vcmp.eq.s32.totalorder %v3997_v11, %v3988_v8  ;;  %vm515_vm13 = vcmp.eq.s32.totalorder %v3984_v6, %v3988_v8  ;;  %v4159_v28 = vadd.s32 32, %v3962_v1  ;;  %p3796_p11 = scmp.ne.s32.totalorder %s3794_s30, %s3795_s18  ;;  %p3801_p1 = scmp.lt.s32.totalorder %s3799_s22, %s3795_s18 }
  0x24   : > { %3309 = vmatpush.msk.msra.mxu2 %vm497_vm5, %v3843_v13  ;;  %vm490_vm14 = vcmp.eq.s32.totalorder %v4022_v14, %v3986_v7  ;;  %vm508_vm15 = vcmp.eq.s32.totalorder %v4025_v15, %v3986_v7  ;;  %3324 = vmatpush.msk.msra.mxu3 %vm517_vm11, %v3843_v13  ;;  %vm491_vm0 = vcmp.eq.s32.totalorder %v4022_v14, %v3988_v8  ;;  %v4174_v29 = vadd.s32 24, %v3962_v1 }
  0x25   : > { %3283 = vmatpush.msk.msra.mxu0 %vm494_vm6, %v3843_v13  ;;  %3299 = vmatpush.msk.msra.mxu1 %vm512_vm7, %v3843_v13  ;;  %vm513_vm1 = vcmp.eq.s32.totalorder %v3994_v10, %v3988_v8  ;;  %vm488_vm2 = vcmp.eq.s32.totalorder %v4032_v16, %v3986_v7  ;;  %vm506_vm3 = vcmp.eq.s32.totalorder %v4042_v17, %v3986_v7  ;;  %v4189_v30 = vadd.s32 16, %v3962_v1  ;;  %p3797_p12 = pnand %p3796_p11, %p3948_p5  ;;  %p3802_p2 = por %p3801_p1, %p3800_p0 }
  0x26   : > { %3310 = vmatpush.msk.msra.mxu2 %vm495_vm8, %v3843_v13  ;;  %3325 = vmatpush.msk.msra.mxu3 %vm515_vm13, %v3843_v13  ;;  %vm489_vm4 = vcmp.eq.s32.totalorder %v4032_v16, %v3988_v8  ;;  %vm511_vm5 = vcmp.eq.s32.totalorder %v4000_v12, %v3988_v8  ;;  %vm486_vm6 = vcmp.eq.s32.totalorder %v4057_v18, %v3986_v7  ;;  %v4204_v31 = vadd.s32 8, %v3962_v1 }
  0x27   : > { %3284 = vmatpush.msk.msra.mxu0 %vm492_vm9, %v3843_v13  ;;  %3300 = vmatpush.msk.msra.mxu1 %vm510_vm10, %v3843_v13  ;;  %vm504_vm7 = vcmp.eq.s32.totalorder %v4060_v19, %v3986_v7  ;;  %vm487_vm8 = vcmp.eq.s32.totalorder %v4057_v18, %v3988_v8  ;;  %vm509_vm9 = vcmp.eq.s32.totalorder %v4025_v15, %v3988_v8  ;;  %v4247_v33 = vperm.slane %v4081_v22, 1  ;;  %v4999_v22 = vld [vmem:[%s5782_s3 + $0x38] sm:$0xff]  ;;  %p3798_p13 = pneg %p3797_p12 }
  0x28   : > { %3311 = vmatpush.msk.msra.mxu2 %vm493_vm12, %v3843_v13  ;;  %3326 = vmatpush.msk.msra.mxu3 %vm513_vm1, %v3843_v13  ;;  %vm484_vm10 = vcmp.eq.s32.totalorder %v4075_v20, %v3986_v7  ;;  %vm502_vm11 = vcmp.eq.s32.totalorder %v4078_v21, %v3986_v7  ;;  %vm485_vm12 = vcmp.eq.s32.totalorder %v4075_v20, %v3988_v8  ;;  %v4344_v38 = vperm.slane %v3179_v37, 0 }
  0x29   : > { %3285 = vmatpush.msk.msra.mxu0 %vm490_vm14, %v3843_v13  ;;  %3301 = vmatpush.msk.msra.mxu1 %vm508_vm15, %v3843_v13  ;;  %vm507_vm13 = vcmp.eq.s32.totalorder %v4042_v17, %v3988_v8  ;;  %vm482_vm14 = vcmp.eq.s32.totalorder %v4102_v23, %v3986_v7  ;;  %vm500_vm15 = vcmp.eq.s32.totalorder %v4105_v24, %v3986_v7  ;;  %v4366_v39 = vperm.slane %v3179_v37, 1  ;;  %p3803_p3 = pnand %p3802_p2, %p3798_p13 }
  0x2a   : > { %3312 = vmatpush.msk.msra.mxu2 %vm491_vm0, %v3843_v13  ;;  %3327 = vmatpush.msk.msra.mxu3 %vm511_vm5, %v3843_v13  ;;  %vm483_vm0 = vcmp.eq.s32.totalorder %v4102_v23, %v3988_v8  ;;  %vm652_vm1 = vcmp.eq.s32.totalorder %v3974_v2, %v4120_v25  ;;  %vm650_vm5 = vcmp.eq.s32.totalorder %v3980_v4, %v4120_v25  ;;  %v4517_v41 = vperm.slane %v3230_v40, 0 }
  0x2b   : > { %3286 = vmatpush.msk.msra.mxu0 %vm488_vm2, %v3843_v13  ;;  %3302 = vmatpush.msk.msra.mxu1 %vm506_vm3, %v3843_v13  ;;  %vm480_vm2 = vcmp.eq.s32.totalorder %v4129_v26, %v3986_v7  ;;  %vm505_vm3 = vcmp.eq.s32.totalorder %v4060_v19, %v3988_v8  ;;  %v4571_v42 = vperm.slane %v3230_v40, 1  ;;  %v4680_v44 = vperm.slane %v1455_v43, 1 }
  0x2c   : > { %3313 = vmatpush.msk.msra.mxu2 %vm489_vm4, %v3843_v13  ;;  %3328 = vmatpush.msk.msra.mxu3 %vm509_vm9, %v3843_v13  ;;  %vm481_vm4 = vcmp.eq.s32.totalorder %v4129_v26, %v3988_v8  ;;  %vm648_vm9 = vcmp.eq.s32.totalorder %v3991_v9, %v4120_v25  ;;  %v4688_v45 = vperm.slane %v1455_v43, 0  ;;  %v3844_v40 = vmov 0   ;;  %v2076_v43 = vld [vmem:[%s5784_s5 + $0x38] sm:$0xff] }
  0x2d   : > { %3287 = vmatpush.msk.msra.mxu0 %vm486_vm6, %v3843_v13  ;;  %3303 = vmatpush.msk.msra.mxu1 %vm504_vm7, %v3843_v13  ;;  %vm478_vm6 = vcmp.eq.s32.totalorder %v4144_v27, %v3986_v7  ;;  %vm503_vm7 = vcmp.eq.s32.totalorder %v4078_v21, %v3988_v8 }
  0x2e   : > { %3314 = vmatpush.msk.msra.mxu2 %vm487_vm8, %v3843_v13  ;;  %3329 = vmatpush.msk.msra.mxu3 %vm507_vm13, %v3843_v13  ;;  %vm479_vm8 = vcmp.eq.s32.totalorder %v4144_v27, %v3988_v8  ;;  %vm646_vm13 = vcmp.eq.s32.totalorder %v3997_v11, %v4120_v25 }
  0x2f   : > { %3288 = vmatpush.msk.msra.mxu0 %vm484_vm10, %v3843_v13  ;;  %3304 = vmatpush.msk.msra.mxu1 %vm502_vm11, %v3843_v13  ;;  %vm476_vm10 = vcmp.eq.s32.totalorder %v4159_v28, %v3986_v7  ;;  %vm501_vm11 = vcmp.eq.s32.totalorder %v4105_v24, %v3988_v8 }
  0x30   : > { %3315 = vmatpush.msk.msra.mxu2 %vm485_vm12, %v3843_v13  ;;  %3330 = vmatpush.msk.msra.mxu3 %vm505_vm3, %v3843_v13  ;;  %vm477_vm12 = vcmp.eq.s32.totalorder %v4159_v28, %v3988_v8  ;;  %vm1080_vm3 = vcmask 588800  }
  0x31   : > { %3289 = vmatpush.msk.msra.mxu0 %vm482_vm14, %v3843_v13  ;;  %3305 = vmatpush.msk.msra.mxu1 %vm500_vm15, %v3843_v13  ;;  %vm474_vm14 = vcmp.eq.s32.totalorder %v4174_v29, %v3986_v7  ;;  %vm670_vm15 = vcmp.eq.s32.totalorder %v3977_v3, %v4120_v25 }
  0x32   : > { %3316 = vmatpush.msk.msra.mxu2 %vm483_vm0, %v3843_v13  ;;  %3331 = vmatpush.msk.msra.mxu3 %vm503_vm7, %v3843_v13  ;;  %vm475_vm0 = vcmp.eq.s32.totalorder %v4174_v29, %v3988_v8  ;;  %vm470_vm7 = vcmp.eq.s32.totalorder %v4204_v31, %v3986_v7 }
  0x33   : > { %3335 = vmatpush.msk.msrb.mxu1 %vm652_vm1, %v3843_v13  ;;  %3290 = vmatpush.msk.msra.mxu0 %vm480_vm2, %v3843_v13  ;;  %vm644_vm1 = vcmp.eq.s32.totalorder %v4022_v14, %v4120_v25  ;;  %vm472_vm2 = vcmp.eq.s32.totalorder %v4189_v30, %v3986_v7 }
  0x34   : > { %3317 = vmatpush.msk.msra.mxu2 %vm481_vm4, %v3843_v13  ;;  %3332 = vmatpush.msk.msra.mxu3 %vm501_vm11, %v3843_v13  ;;  %vm473_vm4 = vcmp.eq.s32.totalorder %v4189_v30, %v3988_v8  ;;  %vm468_vm11 = vcmp.eq.s32.totalorder %v3962_v1, %v3986_v7 }
  0x35   : > { %3336 = vmatpush.msk.msrb.mxu1 %vm650_vm5, %v3843_v13  ;;  %3291 = vmatpush.msk.msra.mxu0 %vm478_vm6, %v3843_v13  ;;  %vm642_vm5 = vcmp.eq.s32.totalorder %v4032_v16, %v4120_v25  ;;  %vm668_vm6 = vcmp.eq.s32.totalorder %v3984_v6, %v4120_v25 }
  0x36   : > { %3318 = vmatpush.msk.msra.mxu2 %vm479_vm8, %v3843_v13  ;;  %3351 = vmatpush.msk.msrb.mxu3 %vm670_vm15, %v3843_v13  ;;  %vm471_vm8 = vcmp.eq.s32.totalorder %v4204_v31, %v3988_v8  ;;  %vm653_vm15 = vcmp.eq.s32.totalorder %v3974_v2, %v4247_v33 }
  0x37   : > { %3337 = vmatpush.msk.msrb.mxu1 %vm648_vm9, %v3843_v13  ;;  %3292 = vmatpush.msk.msra.mxu0 %vm476_vm10, %v3843_v13  ;;  %vm640_vm9 = vcmp.eq.s32.totalorder %v4057_v18, %v4120_v25  ;;  %vm666_vm10 = vcmp.eq.s32.totalorder %v3994_v10, %v4120_v25 }
  0x38   : > { %3319 = vmatpush.msk.msra.mxu2 %vm477_vm12, %v3843_v13  ;;  %3333 = vmatmul.msk.f32.vlgmr.msra.gmra.mxu3 %vm1080_vm3, %v4219_v32  ;;  %vm469_vm12 = vcmp.eq.s32.totalorder %v3962_v1, %v3988_v8 }
  0x39   : > { %3338 = vmatpush.msk.msrb.mxu1 %vm646_vm13, %v3843_v13  ;;  %3293 = vmatpush.msk.msra.mxu0 %vm474_vm14, %v3843_v13  ;;  %vm638_vm13 = vcmp.eq.s32.totalorder %v4075_v20, %v4120_v25  ;;  %vm664_vm14 = vcmp.eq.s32.totalorder %v4000_v12, %v4120_v25 }
  0x3a   : > { %3320 = vmatpush.msk.msra.mxu2 %vm475_vm0, %v3843_v13  ;;  %3352 = vmatpush.msk.msrb.mxu3 %vm668_vm6, %v3843_v13  ;;  %vm671_vm0 = vcmp.eq.s32.totalorder %v3977_v3, %v4247_v33  ;;  %vm634_vm6 = vcmp.eq.s32.totalorder %v4129_v26, %v4120_v25 }
  0x3b   : > { %3339 = vmatpush.msk.msrb.mxu1 %vm644_vm1, %v3843_v13  ;;  %3294 = vmatpush.msk.msra.mxu0 %vm472_vm2, %v3843_v13  ;;  %vm636_vm1 = vcmp.eq.s32.totalorder %v4102_v23, %v4120_v25  ;;  %vm662_vm2 = vcmp.eq.s32.totalorder %v4025_v15, %v4120_v25 }
  0x3c   : > { %3321 = vmatpush.msk.msra.mxu2 %vm473_vm4, %v3843_v13  ;;  %3353 = vmatpush.msk.msrb.mxu3 %vm666_vm10, %v3843_v13  ;;  %vm651_vm4 = vcmp.eq.s32.totalorder %v3980_v4, %v4247_v33  ;;  %vm632_vm10 = vcmp.eq.s32.totalorder %v4144_v27, %v4120_v25 }
  0x3d   : > { %3340 = vmatpush.msk.msrb.mxu1 %vm642_vm5, %v3843_v13  ;;  %3295 = vmatpush.msk.msra.mxu0 %vm470_vm7, %v3843_v13  ;;  %vm669_vm5 = vcmp.eq.s32.totalorder %v3984_v6, %v4247_v33  ;;  %vm660_vm7 = vcmp.eq.s32.totalorder %v4042_v17, %v4120_v25 }
  0x3e   : > { %3322 = vmatpush.msk.msra.mxu2 %vm471_vm8, %v3843_v13  ;;  %3306 = vmatmul.msk.f32.vlgmr.msra.gmra.mxu1 %vm1080_vm3, %v4219_v32  ;;  %vm649_vm8 = vcmp.eq.s32.totalorder %v3991_v9, %v4247_v33 }
  0x3f   : > { %3341 = vmatpush.msk.msrb.mxu1 %vm640_vm9, %v3843_v13  ;;  %3296 = vmatpush.msk.msra.mxu0 %vm468_vm11, %v3843_v13  ;;  %vm667_vm9 = vcmp.eq.s32.totalorder %v3994_v10, %v4247_v33  ;;  %vm658_vm11 = vcmp.eq.s32.totalorder %v4060_v19, %v4120_v25 }
  0x40   : > { %3323 = vmatpush.msk.msra.mxu2 %vm469_vm12, %v3843_v13  ;;  %1103 = vmatmul.f32.vlgmr.msra.gmra.mxu0 %v4256_v34  ;;  %vm647_vm12 = vcmp.eq.s32.totalorder %v3997_v11, %v4247_v33 }
  0x41   : > { %1149 = vmatmul.f32.vlgmr.msra.gmra.mxu2 %v4256_v34  ;;  %3342 = vmatpush.msk.msrb.mxu1 %vm638_vm13, %v3843_v13  ;;  %vm665_vm13 = vcmp.eq.s32.totalorder %v4000_v12, %v4247_v33 }
  0x42   : > { %3354 = vmatpush.msk.msrb.mxu3 %vm664_vm14, %v3843_v13  ;;  %3362 = vmatpush.msk.msrb.mxu0 %vm653_vm15, %v3843_v13  ;;  %vm630_vm14 = vcmp.eq.s32.totalorder %v4159_v28, %v4120_v25  ;;  %vm656_vm15 = vcmp.eq.s32.totalorder %v4078_v21, %v4120_v25 }
  0x43   : > { %3378 = vmatpush.msk.msrb.mxu2 %vm671_vm0, %v3843_v13  ;;  %3343 = vmatpush.msk.msrb.mxu1 %vm636_vm1, %v3843_v13  ;;  %vm645_vm0 = vcmp.eq.s32.totalorder %v4022_v14, %v4247_v33  ;;  %vm663_vm1 = vcmp.eq.s32.totalorder %v4025_v15, %v4247_v33 }
  0x44   : > { %3355 = vmatpush.msk.msrb.mxu3 %vm662_vm2, %v3843_v13  ;;  %3363 = vmatpush.msk.msrb.mxu0 %vm651_vm4, %v3843_v13  ;;  %vm628_vm2 = vcmp.eq.s32.totalorder %v4174_v29, %v4120_v25  ;;  %vm654_vm4 = vcmp.eq.s32.totalorder %v4105_v24, %v4120_v25 }
  0x45   : > { %3379 = vmatpush.msk.msrb.mxu2 %vm669_vm5, %v3843_v13  ;;  %3334 = vmatmul.msk.f32.gmra.mxu3 %vm1080_vm3, %v4290_v35  ;;  %vm643_vm5 = vcmp.eq.s32.totalorder %v4032_v16, %v4247_v33 }
  0x46   : > { %3344 = vmatpush.msk.msrb.mxu1 %vm634_vm6, %v3843_v13  ;;  %3356 = vmatpush.msk.msrb.mxu3 %vm660_vm7, %v3843_v13  ;;  %vm661_vm6 = vcmp.eq.s32.totalorder %v4042_v17, %v4247_v33  ;;  %vm626_vm7 = vcmp.eq.s32.totalorder %v4189_v30, %v4120_v25 }
  0x47   : > { %3364 = vmatpush.msk.msrb.mxu0 %vm649_vm8, %v3843_v13  ;;  %3380 = vmatpush.msk.msrb.mxu2 %vm667_vm9, %v3843_v13  ;;  %vm641_vm8 = vcmp.eq.s32.totalorder %v4057_v18, %v4247_v33  ;;  %vm659_vm9 = vcmp.eq.s32.totalorder %v4060_v19, %v4247_v33 }
  0x48   : > { %3345 = vmatpush.msk.msrb.mxu1 %vm632_vm10, %v3843_v13  ;;  %3357 = vmatpush.msk.msrb.mxu3 %vm658_vm11, %v3843_v13  ;;  %vm624_vm10 = vcmp.eq.s32.totalorder %v4204_v31, %v4120_v25  ;;  %vm806_vm11 = vcmp.eq.s32.totalorder %v3974_v2, %v4344_v38 }
  0x49   : > { %3365 = vmatpush.msk.msrb.mxu0 %vm647_vm12, %v3843_v13  ;;  %3381 = vmatpush.msk.msrb.mxu2 %vm665_vm13, %v3843_v13  ;;  %vm639_vm12 = vcmp.eq.s32.totalorder %v4075_v20, %v4247_v33  ;;  %vm657_vm13 = vcmp.eq.s32.totalorder %v4078_v21, %v4247_v33 }
  0x4a   : > { %1106 = vmatmul.f32.gmra.mxu0 %v4320_v36  ;;  %3307 = vmatmul.msk.f32.gmra.mxu1 %vm1080_vm3, %v4290_v35 }
  0x4b   : > { %1152 = vmatmul.f32.gmra.mxu2 %v4320_v36  ;;  %3346 = vmatpush.msk.msrb.mxu1 %vm630_vm14, %v3843_v13  ;;  %vm622_vm14 = vcmp.eq.s32.totalorder %v3962_v1, %v4120_v25 }
  0x4c   : > { %3358 = vmatpush.msk.msrb.mxu3 %vm656_vm15, %v3843_v13  ;;  %3366 = vmatpush.msk.msrb.mxu0 %vm645_vm0, %v3843_v13  ;;  %vm804_vm15 = vcmp.eq.s32.totalorder %v3980_v4, %v4344_v38  ;;  %vm637_vm0 = vcmp.eq.s32.totalorder %v4102_v23, %v4247_v33 }
  0x4d   : > { %3382 = vmatpush.msk.msrb.mxu2 %vm663_vm1, %v3843_v13  ;;  %3347 = vmatpush.msk.msrb.mxu1 %vm628_vm2, %v3843_v13  ;;  %vm655_vm1 = vcmp.eq.s32.totalorder %v4105_v24, %v4247_v33  ;;  %vm807_vm2 = vcmp.eq.s32.totalorder %v3974_v2, %v4366_v39 }
  0x4e   : > { %3359 = vmatpush.msk.msrb.mxu3 %vm654_vm4, %v3843_v13  ;;  %3367 = vmatpush.msk.msrb.mxu0 %vm643_vm5, %v3843_v13  ;;  %vm635_vm4 = vcmp.eq.s32.totalorder %v4129_v26, %v4247_v33  ;;  %vm805_vm5 = vcmp.eq.s32.totalorder %v3980_v4, %v4366_v39 }
  0x4f   : > { %3383 = vmatpush.msk.msrb.mxu2 %vm661_vm6, %v3843_v13  ;;  %3360 = vmatmul.msk.f32.vlgmr.msrb.gmra.mxu3 %vm1080_vm3, %v4219_v32  ;;  %vm633_vm6 = vcmp.eq.s32.totalorder %v4144_v27, %v4247_v33 }
  0x50   : > { %3348 = vmatpush.msk.msrb.mxu1 %vm626_vm7, %v3843_v13  ;;  %3368 = vmatpush.msk.msrb.mxu0 %vm641_vm8, %v3843_v13  ;;  %vm802_vm7 = vcmp.eq.s32.totalorder %v3991_v9, %v4344_v38  ;;  %vm803_vm8 = vcmp.eq.s32.totalorder %v3991_v9, %v4366_v39 }
  0x51   : > { %3384 = vmatpush.msk.msrb.mxu2 %vm659_vm9, %v3843_v13  ;;  %3389 = vmatpush.msk.msra.mxu3 %vm806_vm11, %v3843_v13  ;;  %vm824_vm9 = vcmp.eq.s32.totalorder %v3977_v3, %v4344_v38  ;;  %vm800_vm11 = vcmp.eq.s32.totalorder %v3997_v11, %v4344_v38 }
  0x52   : > { %3349 = vmatpush.msk.msrb.mxu1 %vm624_vm10, %v3843_v13  ;;  %3369 = vmatpush.msk.msrb.mxu0 %vm639_vm12, %v3843_v13  ;;  %vm631_vm10 = vcmp.eq.s32.totalorder %v4159_v28, %v4247_v33  ;;  %vm801_vm12 = vcmp.eq.s32.totalorder %v3997_v11, %v4366_v39 }
  0x53   : > { %3385 = vmatpush.msk.msrb.mxu2 %vm657_vm13, %v3843_v13  ;;  %3390 = vmatpush.msk.msra.mxu3 %vm804_vm15, %v3843_v13  ;;  %vm822_vm13 = vcmp.eq.s32.totalorder %v3984_v6, %v4344_v38  ;;  %vm798_vm15 = vcmp.eq.s32.totalorder %v4022_v14, %v4344_v38 }
  0x54   : > { %3350 = vmatpush.msk.msrb.mxu1 %vm622_vm14, %v3843_v13  ;;  %3370 = vmatpush.msk.msrb.mxu0 %vm637_vm0, %v3843_v13  ;;  %vm629_vm14 = vcmp.eq.s32.totalorder %v4174_v29, %v4247_v33  ;;  %vm799_vm0 = vcmp.eq.s32.totalorder %v4022_v14, %v4366_v39 }
  0x55   : > { %3386 = vmatpush.msk.msrb.mxu2 %vm655_vm1, %v3843_v13  ;;  %1195 = vmatmul.f32.vlgmr.msrb.gmra.mxu1 %v4256_v34  ;;  %vm627_vm1 = vcmp.eq.s32.totalorder %v4189_v30, %v4247_v33 }
  0x56   : > { %3371 = vmatpush.msk.msrb.mxu0 %vm635_vm4, %v3843_v13  ;;  %3387 = vmatmul.msk.f32.vlgmr.msrb.gmra.mxu2 %vm1080_vm3, %v4219_v32  ;;  %vm796_vm4 = vcmp.eq.s32.totalorder %v4032_v16, %v4344_v38 }
  0x57   : > { %3416 = vmatpush.msk.msra.mxu2 %vm807_vm2, %v3843_v13  ;;  %3361 = vmatmul.msk.f32.gmra.mxu3 %vm1080_vm3, %v4290_v35  ;;  %vm797_vm2 = vcmp.eq.s32.totalorder %v4032_v16, %v4366_v39 }
  0x58   : > { %3372 = vmatpush.msk.msrb.mxu0 %vm633_vm6, %v3843_v13  ;;  %3391 = vmatpush.msk.msra.mxu3 %vm802_vm7, %v3843_v13  ;;  %vm820_vm6 = vcmp.eq.s32.totalorder %v3994_v10, %v4344_v38  ;;  %vm795_vm7 = vcmp.eq.s32.totalorder %v4057_v18, %v4366_v39 }
  0x59   : > { %3417 = vmatpush.msk.msra.mxu2 %vm805_vm5, %v3843_v13  ;;  %3405 = vmatpush.msk.msra.mxu1 %vm824_vm9, %v3843_v13  ;;  %vm625_vm5 = vcmp.eq.s32.totalorder %v4204_v31, %v4247_v33  ;;  %vm623_vm9 = vcmp.eq.s32.totalorder %v3962_v1, %v4247_v33 }
  0x5a   : > { %3373 = vmatpush.msk.msrb.mxu0 %vm631_vm10, %v3843_v13  ;;  %3392 = vmatpush.msk.msra.mxu3 %vm800_vm11, %v3843_v13  ;;  %vm818_vm10 = vcmp.eq.s32.totalorder %v4000_v12, %v4344_v38  ;;  %vm793_vm11 = vcmp.eq.s32.totalorder %v4075_v20, %v4366_v39 }
  0x5b   : > { %3418 = vmatpush.msk.msra.mxu2 %vm803_vm8, %v3843_v13  ;;  %3406 = vmatpush.msk.msra.mxu1 %vm822_vm13, %v3843_v13  ;;  %vm794_vm8 = vcmp.eq.s32.totalorder %v4057_v18, %v4344_v38  ;;  %vm792_vm13 = vcmp.eq.s32.totalorder %v4075_v20, %v4344_v38 }
  0x5c   : > { %3374 = vmatpush.msk.msrb.mxu0 %vm629_vm14, %v3843_v13  ;;  %3393 = vmatpush.msk.msra.mxu3 %vm798_vm15, %v3843_v13  ;;  %vm791_vm14 = vcmp.eq.s32.totalorder %v4102_v23, %v4366_v39  ;;  %vm816_vm15 = vcmp.eq.s32.totalorder %v4025_v15, %v4344_v38 }
  0x5d   : > { %3419 = vmatpush.msk.msra.mxu2 %vm801_vm12, %v3843_v13  ;;  %1198 = vmatmul.f32.gmra.mxu1 %v4320_v36  ;;  %vm825_vm12 = vcmp.eq.s32.totalorder %v3977_v3, %v4366_v39 }
  0x5e   : > { %3375 = vmatpush.msk.msrb.mxu0 %vm627_vm1, %v3843_v13  ;;  %3388 = vmatmul.msk.f32.gmra.mxu2 %vm1080_vm3, %v4290_v35  ;;  %vm790_vm1 = vcmp.eq.s32.totalorder %v4102_v23, %v4344_v38 }
  0x5f   : > { %3420 = vmatpush.msk.msra.mxu2 %vm799_vm0, %v3843_v13  ;;  %3394 = vmatpush.msk.msra.mxu3 %vm796_vm4, %v3843_v13  ;;  %vm823_vm0 = vcmp.eq.s32.totalorder %v3984_v6, %v4366_v39  ;;  %vm814_vm4 = vcmp.eq.s32.totalorder %v4042_v17, %v4344_v38 }
  0x60   : > { %3376 = vmatpush.msk.msrb.mxu0 %vm625_vm5, %v3843_v13  ;;  %3407 = vmatpush.msk.msra.mxu1 %vm820_vm6, %v3843_v13  ;;  %vm821_vm5 = vcmp.eq.s32.totalorder %v3994_v10, %v4366_v39  ;;  %vm788_vm6 = vcmp.eq.s32.totalorder %v4129_v26, %v4344_v38 }
  0x61   : > { %3421 = vmatpush.msk.msra.mxu2 %vm797_vm2, %v3843_v13  ;;  %3395 = vmatpush.msk.msra.mxu3 %vm794_vm8, %v3843_v13  ;;  %vm789_vm2 = vcmp.eq.s32.totalorder %v4129_v26, %v4366_v39  ;;  %vm812_vm8 = vcmp.eq.s32.totalorder %v4060_v19, %v4344_v38 }
  0x62   : > { %3377 = vmatpush.msk.msrb.mxu0 %vm623_vm9, %v3843_v13  ;;  %3408 = vmatpush.msk.msra.mxu1 %vm818_vm10, %v3843_v13  ;;  %vm819_vm9 = vcmp.eq.s32.totalorder %v4000_v12, %v4366_v39  ;;  %vm786_vm10 = vcmp.eq.s32.totalorder %v4144_v27, %v4344_v38 }
  0x63   : > { %3422 = vmatpush.msk.msra.mxu2 %vm795_vm7, %v3843_v13  ;;  %1241 = vmatmul.f32.vlgmr.msrb.gmra.mxu0 %v4256_v34  ;;  %vm787_vm7 = vcmp.eq.s32.totalorder %v4144_v27, %v4366_v39 }
  0x64   : > { %3432 = vmatpush.msk.msra.mxu0 %vm825_vm12, %v3843_v13  ;;  %3396 = vmatpush.msk.msra.mxu3 %vm792_vm13, %v3843_v13  ;;  %vm817_vm12 = vcmp.eq.s32.totalorder %v4025_v15, %v4366_v39  ;;  %vm810_vm13 = vcmp.eq.s32.totalorder %v4078_v21, %v4344_v38 }
  0x65   : > { %3423 = vmatpush.msk.msra.mxu2 %vm793_vm11, %v3843_v13  ;;  %3409 = vmatpush.msk.msra.mxu1 %vm816_vm15, %v3843_v13  ;;  %vm785_vm11 = vcmp.eq.s32.totalorder %v4159_v28, %v4366_v39  ;;  %vm784_vm15 = vcmp.eq.s32.totalorder %v4159_v28, %v4344_v38 }
  0x66   : > { %3433 = vmatpush.msk.msra.mxu0 %vm823_vm0, %v3843_v13  ;;  %3397 = vmatpush.msk.msra.mxu3 %vm790_vm1, %v3843_v13  ;;  %vm815_vm0 = vcmp.eq.s32.totalorder %v4042_v17, %v4366_v39  ;;  %vm808_vm1 = vcmp.eq.s32.totalorder %v4105_v24, %v4344_v38 }
  0x67   : > { %3424 = vmatpush.msk.msra.mxu2 %vm791_vm14, %v3843_v13  ;;  %3410 = vmatpush.msk.msra.mxu1 %vm814_vm4, %v3843_v13  ;;  %vm783_vm14 = vcmp.eq.s32.totalorder %v4174_v29, %v4366_v39  ;;  %vm960_vm4 = vcmp.eq.s32.totalorder %v3974_v2, %v4517_v41 }
  0x68   : > { %3434 = vmatpush.msk.msra.mxu0 %vm821_vm5, %v3843_v13  ;;  %3398 = vmatpush.msk.msra.mxu3 %vm788_vm6, %v3843_v13  ;;  %vm813_vm5 = vcmp.eq.s32.totalorder %v4060_v19, %v4366_v39  ;;  %vm782_vm6 = vcmp.eq.s32.totalorder %v4174_v29, %v4344_v38 }
  0x69   : > { %3425 = vmatpush.msk.msra.mxu2 %vm789_vm2, %v3843_v13  ;;  %3411 = vmatpush.msk.msra.mxu1 %vm812_vm8, %v3843_v13  ;;  %vm781_vm2 = vcmp.eq.s32.totalorder %v4189_v30, %v4366_v39  ;;  %vm958_vm8 = vcmp.eq.s32.totalorder %v3980_v4, %v4517_v41 }
  0x6a   : > { %3435 = vmatpush.msk.msra.mxu0 %vm819_vm9, %v3843_v13  ;;  %3399 = vmatpush.msk.msra.mxu3 %vm786_vm10, %v3843_v13  ;;  %vm811_vm9 = vcmp.eq.s32.totalorder %v4078_v21, %v4366_v39  ;;  %vm780_vm10 = vcmp.eq.s32.totalorder %v4189_v30, %v4344_v38 }
  0x6b   : > { %3426 = vmatpush.msk.msra.mxu2 %vm787_vm7, %v3843_v13  ;;  %1244 = vmatmul.f32.gmra.mxu0 %v4320_v36  ;;  %vm779_vm7 = vcmp.eq.s32.totalorder %v4204_v31, %v4366_v39 }
  0x6c   : > { %3436 = vmatpush.msk.msra.mxu0 %vm817_vm12, %v3843_v13  ;;  %3412 = vmatpush.msk.msra.mxu1 %vm810_vm13, %v3843_v13  ;;  %vm956_vm12 = vcmp.eq.s32.totalorder %v3991_v9, %v4517_v41  ;;  %vm809_vm13 = vcmp.eq.s32.totalorder %v4105_v24, %v4366_v39 }
  0x6d   : > { %3427 = vmatpush.msk.msra.mxu2 %vm785_vm11, %v3843_v13  ;;  %3400 = vmatpush.msk.msra.mxu3 %vm784_vm15, %v3843_v13  ;;  %vm777_vm11 = vcmp.eq.s32.totalorder %v3962_v1, %v4366_v39  ;;  %vm954_vm15 = vcmp.eq.s32.totalorder %v3997_v11, %v4517_v41  ;;  %v2074_v39 = vld [vmem:[%s5784_s5 + $0x28] sm:$0xff] }
  0x6e   : > { %3437 = vmatpush.msk.msra.mxu0 %vm815_vm0, %v3843_v13  ;;  %3413 = vmatpush.msk.msra.mxu1 %vm808_vm1, %v3843_v13  ;;  %vm979_vm0 = vcmp.eq.s32.totalorder %v3977_v3, %v4571_v42  ;;  %vm776_vm1 = vcmp.eq.s32.totalorder %v3962_v1, %v4344_v38 }
  0x6f   : > { %3428 = vmatpush.msk.msra.mxu2 %vm783_vm14, %v3843_v13  ;;  %3401 = vmatpush.msk.msra.mxu3 %vm782_vm6, %v3843_v13  ;;  %vm778_vm14 = vcmp.eq.s32.totalorder %v4204_v31, %v4344_v38  ;;  %vm950_vm6 = vcmp.eq.s32.totalorder %v4032_v16, %v4517_v41 }
  0x70   : > { %3443 = vmatpush.msk.msrb.mxu1 %vm960_vm4, %v3843_v13  ;;  %3438 = vmatpush.msk.msra.mxu0 %vm813_vm5, %v3843_v13  ;;  %vm978_vm4 = vcmp.eq.s32.totalorder %v3977_v3, %v4517_v41  ;;  %vm977_vm5 = vcmp.eq.s32.totalorder %v3984_v6, %v4571_v42 }
  0x71   : > { %3429 = vmatpush.msk.msra.mxu2 %vm781_vm2, %v3843_v13  ;;  %3402 = vmatpush.msk.msra.mxu3 %vm780_vm10, %v3843_v13  ;;  %vm952_vm2 = vcmp.eq.s32.totalorder %v4022_v14, %v4517_v41  ;;  %vm948_vm10 = vcmp.eq.s32.totalorder %v4057_v18, %v4517_v41 }
  0x72   : > { %3444 = vmatpush.msk.msrb.mxu1 %vm958_vm8, %v3843_v13  ;;  %3439 = vmatpush.msk.msra.mxu0 %vm811_vm9, %v3843_v13  ;;  %vm976_vm8 = vcmp.eq.s32.totalorder %v3984_v6, %v4517_v41  ;;  %vm975_vm9 = vcmp.eq.s32.totalorder %v3994_v10, %v4571_v42 }
  0x73   : > { %3430 = vmatpush.msk.msra.mxu2 %vm779_vm7, %v3843_v13  ;;  %3403 = vmatpush.msk.msra.mxu3 %vm778_vm14, %v3843_v13  ;;  %vm961_vm7 = vcmp.eq.s32.totalorder %v3974_v2, %v4571_v42  ;;  %vm972_vm14 = vcmp.eq.s32.totalorder %v4000_v12, %v4517_v41 }
  0x74   : > { %3445 = vmatpush.msk.msrb.mxu1 %vm956_vm12, %v3843_v13  ;;  %3440 = vmatpush.msk.msra.mxu0 %vm809_vm13, %v3843_v13  ;;  %vm946_vm12 = vcmp.eq.s32.totalorder %v4075_v20, %v4517_v41  ;;  %vm973_vm13 = vcmp.eq.s32.totalorder %v4000_v12, %v4571_v42 }
  0x75   : > { %3431 = vmatpush.msk.msra.mxu2 %vm777_vm11, %v3843_v13  ;;  %3441 = vmatmul.msk.f32.vlgmr.msra.gmra.mxu0 %vm1080_vm3, %v4219_v32  ;;  %vm974_vm11 = vcmp.eq.s32.totalorder %v3994_v10, %v4517_v41 }
  0x76   : > { %1333 = vmatmul.f32.vlgmr.msra.gmra.mxu2 %v4256_v34  ;;  %3446 = vmatpush.msk.msrb.mxu1 %vm954_vm15, %v3843_v13  ;;  %vm959_vm15 = vcmp.eq.s32.totalorder %v3980_v4, %v4571_v42 }
  0x77   : > { %3486 = vmatpush.msk.msrb.mxu2 %vm979_vm0, %v3843_v13  ;;  %3404 = vmatpush.msk.msra.mxu3 %vm776_vm1, %v3843_v13  ;;  %vm944_vm0 = vcmp.eq.s32.totalorder %v4102_v23, %v4517_v41  ;;  %vm970_vm1 = vcmp.eq.s32.totalorder %v4025_v15, %v4517_v41 }
  0x78   : > { %3414 = vmatmul.msk.f32.vlgmr.msra.gmra.mxu1 %vm1080_vm3, %v4219_v32  ;;  %1287 = vmatmul.f32.vlgmr.msra.gmra.mxu3 %v4256_v34 }
  0x79   : > { %3447 = vmatpush.msk.msrb.mxu1 %vm952_vm2, %v3843_v13  ;;  %3459 = vmatpush.msk.msrb.mxu3 %vm978_vm4, %v3843_v13  ;;  %vm971_vm2 = vcmp.eq.s32.totalorder %v4025_v15, %v4571_v42  ;;  %vm942_vm4 = vcmp.eq.s32.totalorder %v4129_v26, %v4517_v41 }
  0x7a   : > { %3487 = vmatpush.msk.msrb.mxu2 %vm977_vm5, %v3843_v13  ;;  %3470 = vmatpush.msk.msrb.mxu0 %vm961_vm7, %v3843_v13  ;;  %vm957_vm5 = vcmp.eq.s32.totalorder %v3991_v9, %v4571_v42  ;;  %vm969_vm7 = vcmp.eq.s32.totalorder %v4042_v17, %v4571_v42 }
  0x7b   : > { %3448 = vmatpush.msk.msrb.mxu1 %vm950_vm6, %v3843_v13  ;;  %3460 = vmatpush.msk.msrb.mxu3 %vm976_vm8, %v3843_v13  ;;  %vm968_vm6 = vcmp.eq.s32.totalorder %v4042_v17, %v4517_v41  ;;  %vm940_vm8 = vcmp.eq.s32.totalorder %v4144_v27, %v4517_v41 }
  0x7c   : > { %3488 = vmatpush.msk.msrb.mxu2 %vm975_vm9, %v3843_v13  ;;  %3471 = vmatpush.msk.msrb.mxu0 %vm959_vm15, %v3843_v13  ;;  %vm955_vm9 = vcmp.eq.s32.totalorder %v3997_v11, %v4571_v42  ;;  %vm965_vm15 = vcmp.eq.s32.totalorder %v4078_v21, %v4571_v42 }
  0x7d   : > { %3449 = vmatpush.msk.msrb.mxu1 %vm948_vm10, %v3843_v13  ;;  %3442 = vmatmul.msk.f32.gmra.mxu0 %vm1080_vm3, %v4290_v35  ;;  %vm966_vm10 = vcmp.eq.s32.totalorder %v4060_v19, %v4517_v41 }
  0x7e   : > { %1336 = vmatmul.f32.gmra.mxu2 %v4320_v36  ;;  %3461 = vmatpush.msk.msrb.mxu3 %vm974_vm11, %v3843_v13  ;;  %vm967_vm11 = vcmp.eq.s32.totalorder %v4060_v19, %v4571_v42 }
  0x7f   : > { %3450 = vmatpush.msk.msrb.mxu1 %vm946_vm12, %v3843_v13  ;;  %3489 = vmatpush.msk.msrb.mxu2 %vm973_vm13, %v3843_v13  ;;  %vm953_vm12 = vcmp.eq.s32.totalorder %v4022_v14, %v4571_v42  ;;  %vm938_vm13 = vcmp.eq.s32.totalorder %v4159_v28, %v4517_v41 }
  0x80   : > { %3462 = vmatpush.msk.msrb.mxu3 %vm972_vm14, %v3843_v13  ;;  %3472 = vmatpush.msk.msrb.mxu0 %vm957_vm5, %v3843_v13  ;;  %vm964_vm14 = vcmp.eq.s32.totalorder %v4078_v21, %v4517_v41  ;;  %vm1489_vm5 = vcmp.eq.s32.totalorder %v3974_v2, %v4680_v44 }
  0x81   : > { %1290 = vmatmul.f32.gmra.mxu3 %v4320_v36  ;;  %3451 = vmatpush.msk.msrb.mxu1 %vm944_vm0, %v3843_v13  ;;  %vm951_vm0 = vcmp.eq.s32.totalorder %v4032_v16, %v4571_v42 }
  0x82   : > { %3463 = vmatpush.msk.msrb.mxu3 %vm970_vm1, %v3843_v13  ;;  %3490 = vmatpush.msk.msrb.mxu2 %vm971_vm2, %v3843_v13  ;;  %vm936_vm1 = vcmp.eq.s32.totalorder %v4174_v29, %v4517_v41  ;;  %vm962_vm2 = vcmp.eq.s32.totalorder %v4105_v24, %v4517_v41 }
  0x83   : > { %3452 = vmatpush.msk.msrb.mxu1 %vm942_vm4, %v3843_v13  ;;  %3473 = vmatpush.msk.msrb.mxu0 %vm955_vm9, %v3843_v13  ;;  %vm963_vm4 = vcmp.eq.s32.totalorder %v4105_v24, %v4571_v42  ;;  %vm1487_vm9 = vcmp.eq.s32.totalorder %v3980_v4, %v4680_v44 }
  0x84   : > { %3464 = vmatpush.msk.msrb.mxu3 %vm968_vm6, %v3843_v13  ;;  %3491 = vmatpush.msk.msrb.mxu2 %vm969_vm7, %v3843_v13  ;;  %vm934_vm6 = vcmp.eq.s32.totalorder %v4189_v30, %v4517_v41  ;;  %vm949_vm7 = vcmp.eq.s32.totalorder %v4057_v18, %v4571_v42 }
  0x85   : > { %3453 = vmatpush.msk.msrb.mxu1 %vm940_vm8, %v3843_v13  ;;  %3474 = vmatpush.msk.msrb.mxu0 %vm953_vm12, %v3843_v13  ;;  %vm1488_vm8 = vcmp.eq.s32.totalorder %v3974_v2, %v4688_v45  ;;  %vm1485_vm12 = vcmp.eq.s32.totalorder %v3991_v9, %v4680_v44 }
  0x86   : > { %3465 = vmatpush.msk.msrb.mxu3 %vm966_vm10, %v3843_v13  ;;  %3492 = vmatpush.msk.msrb.mxu2 %vm967_vm11, %v3843_v13  ;;  %vm932_vm10 = vcmp.eq.s32.totalorder %v4204_v31, %v4517_v41  ;;  %vm947_vm11 = vcmp.eq.s32.totalorder %v4075_v20, %v4571_v42 }
  0x87   : > { %3415 = vmatmul.msk.f32.gmra.mxu1 %vm1080_vm3, %v4290_v35  ;;  %3475 = vmatpush.msk.msrb.mxu0 %vm951_vm0, %v3843_v13  ;;  %vm1486_vm0 = vcmp.eq.s32.totalorder %v3980_v4, %v4688_v45 }
  0x88   : > { %3454 = vmatpush.msk.msrb.mxu1 %vm938_vm13, %v3843_v13  ;;  %3466 = vmatpush.msk.msrb.mxu3 %vm964_vm14, %v3843_v13  ;;  %vm930_vm13 = vcmp.eq.s32.totalorder %v3962_v1, %v4517_v41  ;;  %vm945_vm14 = vcmp.eq.s32.totalorder %v4102_v23, %v4571_v42 }
  0x89   : > { %3493 = vmatpush.msk.msrb.mxu2 %vm965_vm15, %v3843_v13  ;;  %3476 = vmatpush.msk.msrb.mxu0 %vm949_vm7, %v3843_v13  ;;  %vm1483_vm15 = vcmp.eq.s32.totalorder %v3997_v11, %v4680_v44  ;;  %vm1479_vm7 = vcmp.eq.s32.totalorder %v4032_v16, %v4680_v44 }
  0x8a   : > { %3455 = vmatpush.msk.msrb.mxu1 %vm936_vm1, %v3843_v13  ;;  %3467 = vmatpush.msk.msrb.mxu3 %vm962_vm2, %v3843_v13  ;;  %vm943_vm1 = vcmp.eq.s32.totalorder %v4129_v26, %v4571_v42  ;;  %vm1481_vm2 = vcmp.eq.s32.totalorder %v4022_v14, %v4680_v44 }
  0x8b   : > { %3494 = vmatpush.msk.msrb.mxu2 %vm963_vm4, %v3843_v13  ;;  %3468 = vmatmul.msk.f32.vlgmr.msrb.gmra.mxu3 %vm1080_vm3, %v4219_v32  ;;  %vm1484_vm4 = vcmp.eq.s32.totalorder %v3991_v9, %v4688_v45 }
  0x8c   : > { %3456 = vmatpush.msk.msrb.mxu1 %vm934_vm6, %v3843_v13  ;;  %3547 = vmatpush.msk.msra.mxu3 %vm1488_vm8, %v3843_v13  ;;  %vm1506_vm6 = vcmp.eq.s32.totalorder %v3977_v3, %v4688_v45  ;;  %vm1482_vm8 = vcmp.eq.s32.totalorder %v3997_v11, %v4688_v45  ;;  %v4960_v11 = vld [vmem:[%s5782_s3 + $0x20] sm:$0xff] }
  0x8d   : > { %3574 = vmatpush.msk.msra.mxu2 %vm1489_vm5, %v3843_v13  ;;  %3477 = vmatpush.msk.msrb.mxu0 %vm947_vm11, %v3843_v13  ;;  %vm941_vm5 = vcmp.eq.s32.totalorder %v4144_v27, %v4571_v42  ;;  %vm1480_vm11 = vcmp.eq.s32.totalorder %v4022_v14, %v4688_v45 }
  0x8e   : > { %3457 = vmatpush.msk.msrb.mxu1 %vm932_vm10, %v3843_v13  ;;  %3495 = vmatmul.msk.f32.vlgmr.msrb.gmra.mxu2 %vm1080_vm3, %v4219_v32  ;;  %vm1477_vm10 = vcmp.eq.s32.totalorder %v4057_v18, %v4680_v44 }
  0x8f   : > { %3575 = vmatpush.msk.msra.mxu2 %vm1487_vm9, %v3843_v13  ;;  %3478 = vmatpush.msk.msrb.mxu0 %vm945_vm14, %v3843_v13  ;;  %vm939_vm9 = vcmp.eq.s32.totalorder %v4159_v28, %v4571_v42  ;;  %vm1478_vm14 = vcmp.eq.s32.totalorder %v4032_v16, %v4688_v45  ;;  %v4986_v16 = vld [vmem:[%s5782_s3 + $0x30] sm:$0xff] }
  0x90   : > { %3458 = vmatpush.msk.msrb.mxu1 %vm930_vm13, %v3843_v13  ;;  %3548 = vmatpush.msk.msra.mxu3 %vm1486_vm0, %v3843_v13  ;;  %vm1475_vm13 = vcmp.eq.s32.totalorder %v4075_v20, %v4680_v44  ;;  %vm1504_vm0 = vcmp.eq.s32.totalorder %v3984_v6, %v4688_v45 }
  0x91   : > { %3576 = vmatpush.msk.msra.mxu2 %vm1485_vm12, %v3843_v13  ;;  %1379 = vmatmul.f32.vlgmr.msrb.gmra.mxu1 %v4256_v34  ;;  %vm937_vm12 = vcmp.eq.s32.totalorder %v4174_v29, %v4571_v42 }
  0x92   : > { %3479 = vmatpush.msk.msrb.mxu0 %vm943_vm1, %v3843_v13  ;;  %3549 = vmatpush.msk.msra.mxu3 %vm1484_vm4, %v3843_v13  ;;  %vm1473_vm1 = vcmp.eq.s32.totalorder %v4102_v23, %v4680_v44  ;;  %vm933_vm4 = vcmp.eq.s32.totalorder %v4204_v31, %v4571_v42 }
  0x93   : > { %3577 = vmatpush.msk.msra.mxu2 %vm1483_vm15, %v3843_v13  ;;  %3469 = vmatmul.msk.f32.gmra.mxu3 %vm1080_vm3, %v4290_v35  ;;  %vm935_vm15 = vcmp.eq.s32.totalorder %v4189_v30, %v4571_v42 }
  0x94   : > { %3480 = vmatpush.msk.msrb.mxu0 %vm941_vm5, %v3843_v13  ;;  %3563 = vmatpush.msk.msra.mxu1 %vm1506_vm6, %v3843_v13  ;;  %vm1502_vm5 = vcmp.eq.s32.totalorder %v3994_v10, %v4688_v45  ;;  %vm1471_vm6 = vcmp.eq.s32.totalorder %v4129_v26, %v4680_v44 }
  0x95   : > { %3578 = vmatpush.msk.msra.mxu2 %vm1481_vm2, %v3843_v13  ;;  %3550 = vmatpush.msk.msra.mxu3 %vm1482_vm8, %v3843_v13  ;;  %vm1476_vm2 = vcmp.eq.s32.totalorder %v4057_v18, %v4688_v45  ;;  %vm931_vm8 = vcmp.eq.s32.totalorder %v3962_v1, %v4571_v42 }
  0x96   : > { %3481 = vmatpush.msk.msrb.mxu0 %vm939_vm9, %v3843_v13  ;;  %3496 = vmatmul.msk.f32.gmra.mxu2 %vm1080_vm3, %v4290_v35  ;;  %vm1500_vm9 = vcmp.eq.s32.totalorder %v4000_v12, %v4688_v45 }
  0x97   : > { %3579 = vmatpush.msk.msra.mxu2 %vm1479_vm7, %v3843_v13  ;;  %3551 = vmatpush.msk.msra.mxu3 %vm1480_vm11, %v3843_v13  ;;  %vm1474_vm7 = vcmp.eq.s32.totalorder %v4075_v20, %v4688_v45  ;;  %vm1507_vm11 = vcmp.eq.s32.totalorder %v3977_v3, %v4680_v44 }
  0x98   : > { %3482 = vmatpush.msk.msrb.mxu0 %vm937_vm12, %v3843_v13  ;;  %3564 = vmatpush.msk.msra.mxu1 %vm1504_vm0, %v3843_v13  ;;  %vm1472_vm12 = vcmp.eq.s32.totalorder %v4102_v23, %v4688_v45  ;;  %vm1470_vm0 = vcmp.eq.s32.totalorder %v4129_v26, %v4688_v45 }
  0x99   : > { %3580 = vmatpush.msk.msra.mxu2 %vm1477_vm10, %v3843_v13  ;;  %1382 = vmatmul.f32.gmra.mxu1 %v4320_v36  ;;  %vm1469_vm10 = vcmp.eq.s32.totalorder %v4144_v27, %v4680_v44 }
  0x9a   : > { %3552 = vmatpush.msk.msra.mxu3 %vm1478_vm14, %v3843_v13  ;;  %3483 = vmatpush.msk.msrb.mxu0 %vm935_vm15, %v3843_v13  ;;  %vm1498_vm14 = vcmp.eq.s32.totalorder %v4025_v15, %v4688_v45  ;;  %vm1505_vm15 = vcmp.eq.s32.totalorder %v3984_v6, %v4680_v44  ;;  %v4949_v6 = vld [vmem:[%s5782_s3 + $0x18] sm:$0xff] }
  0x9b   : > { %3581 = vmatpush.msk.msra.mxu2 %vm1475_vm13, %v3843_v13  ;;  %3565 = vmatpush.msk.msra.mxu1 %vm1502_vm5, %v3843_v13  ;;  %vm1467_vm13 = vcmp.eq.s32.totalorder %v4159_v28, %v4680_v44  ;;  %vm1468_vm5 = vcmp.eq.s32.totalorder %v4144_v27, %v4688_v45 }
  0x9c   : > { %3553 = vmatpush.msk.msra.mxu3 %vm1476_vm2, %v3843_v13  ;;  %3484 = vmatpush.msk.msrb.mxu0 %vm933_vm4, %v3843_v13  ;;  %vm1496_vm2 = vcmp.eq.s32.totalorder %v4042_v17, %v4688_v45  ;;  %vm1503_vm4 = vcmp.eq.s32.totalorder %v3994_v10, %v4680_v44 }
  0x9d   : > { %3582 = vmatpush.msk.msra.mxu2 %vm1473_vm1, %v3843_v13  ;;  %3566 = vmatpush.msk.msra.mxu1 %vm1500_vm9, %v3843_v13  ;;  %vm1465_vm1 = vcmp.eq.s32.totalorder %v4174_v29, %v4680_v44  ;;  %vm1466_vm9 = vcmp.eq.s32.totalorder %v4159_v28, %v4688_v45 }
  0x9e   : > { %3554 = vmatpush.msk.msra.mxu3 %vm1474_vm7, %v3843_v13  ;;  %3485 = vmatpush.msk.msrb.mxu0 %vm931_vm8, %v3843_v13  ;;  %vm1494_vm7 = vcmp.eq.s32.totalorder %v4060_v19, %v4688_v45  ;;  %vm1501_vm8 = vcmp.eq.s32.totalorder %v4000_v12, %v4680_v44  ;;  %v4973_v12 = vld [vmem:[%s5782_s3 + $0x28] sm:$0xff] }
  0x9f   : > { %3583 = vmatpush.msk.msra.mxu2 %vm1471_vm6, %v3843_v13  ;;  %1425 = vmatmul.f32.vlgmr.msrb.gmra.mxu0 %v4256_v34  ;;  %vm1463_vm6 = vcmp.eq.s32.totalorder %v4189_v30, %v4680_v44 }
  0xa0   : > { %3590 = vmatpush.msk.msra.mxu0 %vm1507_vm11, %v3843_v13  ;;  %3555 = vmatpush.msk.msra.mxu3 %vm1472_vm12, %v3843_v13  ;;  %vm1499_vm11 = vcmp.eq.s32.totalorder %v4025_v15, %v4680_v44  ;;  %vm1464_vm12 = vcmp.eq.s32.totalorder %v4174_v29, %v4688_v45 }
  0xa1   : > { %3584 = vmatpush.msk.msra.mxu2 %vm1469_vm10, %v3843_v13  ;;  %3567 = vmatpush.msk.msra.mxu1 %vm1498_vm14, %v3843_v13  ;;  %vm1461_vm10 = vcmp.eq.s32.totalorder %v4204_v31, %v4680_v44  ;;  %vm1492_vm14 = vcmp.eq.s32.totalorder %v4078_v21, %v4688_v45 }
  0xa2   : > { %3591 = vmatpush.msk.msra.mxu0 %vm1505_vm15, %v3843_v13  ;;  %3556 = vmatpush.msk.msra.mxu3 %vm1470_vm0, %v3843_v13  ;;  %vm1497_vm15 = vcmp.eq.s32.totalorder %v4042_v17, %v4680_v44  ;;  %vm1462_vm0 = vcmp.eq.s32.totalorder %v4189_v30, %v4688_v45 }
  0xa3   : > { %3585 = vmatpush.msk.msra.mxu2 %vm1467_vm13, %v3843_v13  ;;  %3568 = vmatpush.msk.msra.mxu1 %vm1496_vm2, %v3843_v13  ;;  %vm1459_vm13 = vcmp.eq.s32.totalorder %v3962_v1, %v4680_v44  ;;  %vm1495_vm2 = vcmp.eq.s32.totalorder %v4060_v19, %v4680_v44 }
  0xa4   : > { %3592 = vmatpush.msk.msra.mxu0 %vm1503_vm4, %v3843_v13  ;;  %3557 = vmatpush.msk.msra.mxu3 %vm1468_vm5, %v3843_v13  ;;  %vm1460_vm4 = vcmp.eq.s32.totalorder %v4204_v31, %v4688_v45  ;;  %vm1493_vm5 = vcmp.eq.s32.totalorder %v4078_v21, %v4680_v44 }
  0xa5   : > { %3586 = vmatpush.msk.msra.mxu2 %vm1465_vm1, %v3843_v13  ;;  %3569 = vmatpush.msk.msra.mxu1 %vm1494_vm7, %v3843_v13  ;;  %vm1490_vm1 = vcmp.eq.s32.totalorder %v4105_v24, %v4688_v45  ;;  %vm1491_vm7 = vcmp.eq.s32.totalorder %v4105_v24, %v4680_v44  ;;  %v2073_v44 = vld [vmem:[%s5784_s5 + $0x20] sm:$0xff] }
  0xa6   : > { %3593 = vmatpush.msk.msra.mxu0 %vm1501_vm8, %v3843_v13  ;;  %3558 = vmatpush.msk.msra.mxu3 %vm1466_vm9, %v3843_v13  ;;  %vm1708_vm8 = vcmask 130048   ;;  %vm2727_vm9 = vcmask 261120  }
  0xa7   : > { %3587 = vmatpush.msk.msra.mxu2 %vm1463_vm6, %v3843_v13  ;;  %1428 = vmatmul.f32.gmra.mxu0 %v4320_v36  ;;  %vm1458_vm6 = vcmp.eq.s32.totalorder %v3962_v1, %v4688_v45  ;;  %v4938_v1 = vld [vmem:[%s5782_s3 + $0x10] sm:$0xff] }
  0xa8   : > { %3594 = vmatpush.msk.msra.mxu0 %vm1499_vm11, %v3843_v13  ;;  %3559 = vmatpush.msk.msra.mxu3 %vm1464_vm12, %v3843_v13 }
  0xa9   : > { %3588 = vmatpush.msk.msra.mxu2 %vm1461_vm10, %v3843_v13  ;;  %3570 = vmatpush.msk.msra.mxu1 %vm1492_vm14, %v3843_v13 }
  0xaa   : > { %3595 = vmatpush.msk.msra.mxu0 %vm1497_vm15, %v3843_v13  ;;  %3560 = vmatpush.msk.msra.mxu3 %vm1462_vm0, %v3843_v13 }
  0xab   : > { %3589 = vmatpush.msk.msra.mxu2 %vm1459_vm13, %v3843_v13  ;;  %3571 = vmatpush.msk.msra.mxu1 %vm1490_vm1, %v3843_v13  ;;  %vm2978_vm1 = vcmask 1040384  }
  0xac   : > { %1670 = vmatmul.f32.vlgmr.msra.gmra.mxu2 %v4256_v34  ;;  %3596 = vmatpush.msk.msra.mxu0 %vm1495_vm2, %v3843_v13 }
  0xad   : > { %3572 = vmatmul.msk.f32.vlgmr.msra.gmra.mxu1 %vm1080_vm3, %v4219_v32  ;;  %3561 = vmatpush.msk.msra.mxu3 %vm1460_vm4, %v3843_v13 }
  0xae   : > { %3597 = vmatpush.msk.msra.mxu0 %vm1493_vm5, %v3843_v13  ;;  %3769 = vset.pattern.permute.xlu1 %v3844_v40 }
  0xaf   : > { %3562 = vmatpush.msk.msra.mxu3 %vm1458_vm6, %v3843_v13  ;;  %2104 = vperm.xlu1 %3769, %v2074_v39  }
  0xb0   : > { %3598 = vmatpush.msk.msra.mxu0 %vm1491_vm7, %v3843_v13  ;;  %1624 = vmatmul.f32.vlgmr.msra.gmra.mxu3 %v4256_v34 }
  0xb1   : > { %3599 = vmatmul.msk.f32.vlgmr.msra.gmra.mxu0 %vm1080_vm3, %v4219_v32  ;;  %3768 = vset.pattern.permute.xlu0 %v3844_v40 }
  0xb2   : > { %3770 = vset.pattern.permute.xlu2 %v3844_v40  ;;  %2114 = vperm.xlu0 %3768, %v2076_v43  }
  0xb4   : > { %1673 = vmatmul.f32.gmra.mxu2 %v4320_v36 }
  0xb5   : > { %3573 = vmatmul.msk.f32.gmra.mxu1 %vm1080_vm3, %v4290_v35 }
  0xb7   : > { %2099 = vperm.xlu1 %3769, %v2073_v44  }
  0xb8   : > { %1627 = vmatmul.f32.gmra.mxu3 %v4320_v36 }
  0xb9   : > { %3600 = vmatmul.msk.f32.gmra.mxu0 %vm1080_vm3, %v4290_v35  ;;  %vm2443_vm3 = vcmask 523264  }
  0xbb   : > { %v1127_v47 = vpop.f32.mrf.mxu1  ;;  %v1173_v48 = vpop.f32.mrf.mxu3 }
  0xbd   : > { %v1104_v46 = vpop.f32.mrf.mxu0 }
  0xbe   : > { %v1128_v52 = vadd.f32 %v1127_v47, %v1104_v46 }
  0xc4   : > { %v1150_v49 = vpop.f32.mrf.mxu2 }
  0xc5   : > { %v1174_v58 = vadd.f32 %v1173_v48, %v1150_v49 }
  0xc7   : > { %v1107_v50 = vpop.f32.mrf.mxu0  ;;  %v1130_v51 = vpop.f32.mrf.mxu1 }
  0xc8   : > { %v1131_v53 = vadd.f32 %v1130_v51, %v1107_v50  ;;  %v1176_v54 = vpop.f32.mrf.mxu3  ;;  %v2075_v51 = vld [vmem:[%s5784_s5 + $0x30] sm:$0xff] }
  0xc9   : > { %2109 = vperm.xlu0 %3768, %v2075_v51  }
  0xca   : > { %1747 = vmatpush.msrb.mxu1 %v1131_v53 }
  0xcc   : > { %1748 = vmatpush.msrb.mxu1 %v1128_v52  ;;  %v2069_v52 = vld [vmem:[%s5784_s5] sm:$0xff] }
  0xcd   : > { %3601 = vmatmul.msk.f32.vlgmr.msrb.gmra.mxu1 %vm1708_vm8, %v4922_v55  ;;  %2079 = vperm.xlu1 %3769, %v2069_v52  }
  0xce   : > { %v1153_v56 = vpop.f32.mrf.mxu2 }
  0xcf   : > { %v1177_v57 = vadd.f32 %v1176_v54, %v1153_v56 }
  0xd1   : > { %1788 = vmatpush.msrb.mxu3 %v1177_v57  ;;  %v2070_v57 = vld [vmem:[%s5784_s5 + $0x8] sm:$0xff] }
  0xd2   : > { %v1196_v59 = vpop.f32.mrf.mxu1  ;;  %v1219_v60 = vpop.f32.mrf.mxu3  ;;  %2084 = vperm.xlu0 %3768, %v2070_v57  }
  0xd3   : > { %1789 = vmatpush.msrb.mxu3 %v1174_v58  ;;  %v1220_v2 = vadd.f32 %v1219_v60, %v1196_v59  ;;  %v2061_v59 = vld [vmem:[%s5783_s4] sm:$0xff] }
  0xd4   : > { %3609 = vmatmul.msk.f32.vlgmr.msrb.gmra.mxu3 %vm1708_vm8, %v4922_v55 }
  0xd5   : > { %3602 = vmatmul.msk.f32.gmra.mxu1 %vm1708_vm8, %v4929_v61 }
  0xd9   : > { %v1265_v4 = vpop.f32.mrf.mxu2 }
  0xda   : > { %v1199_v62 = vpop.f32.mrf.mxu1  ;;  %v1222_v63 = vpop.f32.mrf.mxu3 }
  0xdb   : > { %v1223_v3 = vadd.f32 %v1222_v63, %v1199_v62  ;;  %v2072_v63 = vld [vmem:[%s5784_s5 + $0x18] sm:$0xff] }
  0xdc   : > { %3610 = vmatmul.msk.f32.gmra.mxu3 %vm1708_vm8, %v4929_v61  ;;  %2094 = vperm.xlu2 %3770, %v2072_v63  }
  0xdd   : > { %1829 = vmatpush.msrb.mxu0 %v1223_v3  ;;  %3603 = vmatmul.msk.f32.gmra.mxu1 %vm1708_vm8, %v4938_v1 }
  0xdf   : > { %1830 = vmatpush.msrb.mxu0 %v1220_v2  ;;  %v2063_v2 = vld [vmem:[%s5783_s4 + $0x10] sm:$0xff] }
  0xe0   : > { %v1242_v5 = vpop.f32.mrf.mxu0  ;;  %3617 = vmatmul.msk.f32.vlgmr.msrb.gmra.mxu0 %vm1708_vm8, %v4922_v55 }
  0xe1   : > { %v1268_v7 = vpop.f32.mrf.mxu2  ;;  %v1266_v9 = vadd.f32 %v1265_v4, %v1242_v5  ;;  %v2071_v4 = vld [vmem:[%s5784_s5 + $0x10] sm:$0xff] }
  0xe4   : > { %3611 = vmatmul.msk.f32.gmra.mxu3 %vm1708_vm8, %v4938_v1  ;;  %2089 = vperm.xlu2 %3770, %v2071_v4  }
  0xe5   : > { %3604 = vmatmul.msk.f32.gmra.mxu1 %vm1708_vm8, %v4949_v6 }
  0xe8   : > { %v1245_v8 = vpop.f32.mrf.mxu0  ;;  %3618 = vmatmul.msk.f32.gmra.mxu0 %vm1708_vm8, %v4929_v61 }
  0xe9   : > { %v1269_v10 = vadd.f32 %v1268_v7, %v1245_v8 }
  0xeb   : > { %1870 = vmatpush.msrb.mxu2 %v1269_v10 }
  0xec   : > { %3612 = vmatmul.msk.f32.gmra.mxu3 %vm1708_vm8, %v4949_v6 }
  0xed   : > { %1871 = vmatpush.msrb.mxu2 %v1266_v9  ;;  %3605 = vmatmul.msk.f32.gmra.mxu1 %vm1708_vm8, %v4960_v11  ;;  %v2065_v9 = vld [vmem:[%s5783_s4 + $0x20] sm:$0xff] }
  0xee   : > { %3625 = vmatmul.msk.f32.vlgmr.msrb.gmra.mxu2 %vm1708_vm8, %v4922_v55 }
  0xf0   : > { %3619 = vmatmul.msk.f32.gmra.mxu0 %vm1708_vm8, %v4938_v1 }
  0xf2   : > { %v1357_v13 = vpop.f32.mrf.mxu0 }
  0xf4   : > { %3613 = vmatmul.msk.f32.gmra.mxu3 %vm1708_vm8, %v4960_v11 }
  0xf5   : > { %3606 = vmatmul.msk.f32.gmra.mxu1 %vm1708_vm8, %v4973_v12  ;;  %v1311_v15 = vpop.f32.mrf.mxu1 }
  0xf6   : > { %3626 = vmatmul.msk.f32.gmra.mxu2 %vm1708_vm8, %v4929_v61 }
  0xf8   : > { %3620 = vmatmul.msk.f32.gmra.mxu0 %vm1708_vm8, %v4949_v6 }
  0xf9   : > { %v1334_v14 = vpop.f32.mrf.mxu2 }
  0xfa   : > { %v1360_v18 = vpop.f32.mrf.mxu0  ;;  %v1358_v20 = vadd.f32 %v1357_v13, %v1334_v14  ;;  %v2066_v13 = vld [vmem:[%s5783_s4 + $0x28] sm:$0xff] }
  0xfb   : > { %v1288_v17 = vpop.f32.mrf.mxu3 }
  0xfc   : > { %3614 = vmatmul.msk.f32.gmra.mxu3 %vm1708_vm8, %v4973_v12  ;;  %v1312_v25 = vadd.f32 %v1311_v15, %v1288_v17 }
  0xfd   : > { %3607 = vmatmul.msk.f32.gmra.mxu1 %vm1708_vm8, %v4986_v16 }
  0xfe   : > { %3627 = vmatmul.msk.f32.gmra.mxu2 %vm1708_vm8, %v4938_v1 }
 0x100   : > { %3621 = vmatmul.msk.f32.gmra.mxu0 %vm1708_vm8, %v4960_v11 }
 0x101   : > { %v1337_v19 = vpop.f32.mrf.mxu2 }
 0x102   : > { %v1361_v21 = vadd.f32 %v1360_v18, %v1337_v19  ;;  %v2067_v18 = vld [vmem:[%s5783_s4 + $0x30] sm:$0xff]  ;;  %v2420_v19 = vld [vmem:[%s5786_s7 + $0x8] sm:$0xff] }
 0x103   : > { %2430 = vperm.xlu1 %3769, %v2420_v19  }
 0x104   : > { %1952 = vmatpush.msra.mxu3 %v1361_v21  ;;  %v1291_v23 = vpop.f32.mrf.mxu3  ;;  %v1314_v24 = vpop.f32.mrf.mxu1 }
 0x105   : > { %3615 = vmatmul.msk.f32.gmra.mxu3 %vm1708_vm8, %v4986_v16  ;;  %v1315_v26 = vadd.f32 %v1314_v24, %v1291_v23  ;;  %3608 = vmatmul.msk.f32.gmra.mxu1 %vm1708_vm8, %v4999_v22  ;;  %v2068_v23 = vld [vmem:[%s5783_s4 + $0x38] sm:$0xff] }
 0x106   : > { %1953 = vmatpush.msra.mxu3 %v1358_v20  ;;  %3628 = vmatmul.msk.f32.gmra.mxu2 %vm1708_vm8, %v4949_v6 }
 0x107   : > { %1911 = vmatpush.msra.mxu1 %v1315_v26 }
 0x108   : > { %3622 = vmatmul.msk.f32.gmra.mxu0 %vm1708_vm8, %v4973_v12 }
 0x109   : > { %1912 = vmatpush.msra.mxu1 %v1312_v25 }
 0x10d   : > { %3616 = vmatmul.msk.f32.gmra.mxu3 %vm1708_vm8, %v4999_v22  ;;  %3633 = vmatmul.msk.f32.vlgmr.msra.gmra.mxu1 %vm1708_vm8, %v4922_v55 }
 0x10e   : > { %v1380_v27 = vpop.f32.mrf.mxu1  ;;  %v1403_v28 = vpop.f32.mrf.mxu3  ;;  %3629 = vmatmul.msk.f32.gmra.mxu2 %vm1708_vm8, %v4960_v11 }
 0x10f   : > { %v1404_v32 = vadd.f32 %v1403_v28, %v1380_v27 }
 0x110   : > { %3623 = vmatmul.msk.f32.gmra.mxu0 %vm1708_vm8, %v4986_v16 }
 0x111   : > { %v1449_v33 = vpop.f32.mrf.mxu2 }
 0x115   : > { %3641 = vmatmul.msk.f32.vlgmr.msra.gmra.mxu3 %vm1708_vm8, %v4922_v55  ;;  %3634 = vmatmul.msk.f32.gmra.mxu1 %vm1708_vm8, %v4929_v61 }
 0x116   : > { %v1383_v29 = vpop.f32.mrf.mxu1  ;;  %v1406_v30 = vpop.f32.mrf.mxu3  ;;  %3630 = vmatmul.msk.f32.gmra.mxu2 %vm1708_vm8, %v4973_v12 }
 0x117   : > { %v1407_v31 = vadd.f32 %v1406_v30, %v1383_v29  ;;  %v2422_v30 = vld [vmem:[%s5786_s7 + $0x18] sm:$0xff] }
 0x118   : > { %3624 = vmatmul.msk.f32.gmra.mxu0 %vm1708_vm8, %v4999_v22  ;;  %2440 = vperm.xlu2 %3770, %v2422_v30  }
 0x119   : > { %1993 = vmatpush.msra.mxu0 %v1407_v31  ;;  %v1452_v35 = vpop.f32.mrf.mxu2 }
 0x11b   : > { %1994 = vmatpush.msra.mxu0 %v1404_v32 }
 0x11c   : > { %v1426_v34 = vpop.f32.mrf.mxu0 }
 0x11d   : > { %3642 = vmatmul.msk.f32.gmra.mxu3 %vm1708_vm8, %v4929_v61  ;;  %3635 = vmatmul.msk.f32.gmra.mxu1 %vm1708_vm8, %v4938_v1  ;;  %v1450_v37 = vadd.f32 %v1449_v33, %v1426_v34  ;;  %v2419_v34 = vld [vmem:[%s5786_s7] sm:$0xff] }
 0x11e   : > { %3631 = vmatmul.msk.f32.gmra.mxu2 %vm1708_vm8, %v4986_v16 }
 0x120   : > { %3649 = vmatmul.msk.f32.vlgmr.msra.gmra.mxu0 %vm1708_vm8, %v4922_v55  ;;  %2425 = vperm.xlu2 %3770, %v2419_v34  }
 0x124   : > { %v1429_v36 = vpop.f32.mrf.mxu0 }
 0x125   : > { %3643 = vmatmul.msk.f32.gmra.mxu3 %vm1708_vm8, %v4938_v1  ;;  %3636 = vmatmul.msk.f32.gmra.mxu1 %vm1708_vm8, %v4949_v6  ;;  %v1453_v38 = vadd.f32 %v1452_v35, %v1429_v36 }
 0x126   : > { %3632 = vmatmul.msk.f32.gmra.mxu2 %vm1708_vm8, %v4999_v22 }
 0x127   : > { %2034 = vmatpush.msra.mxu2 %v1453_v38 }
 0x128   : > { %3650 = vmatmul.msk.f32.gmra.mxu0 %vm1708_vm8, %v4929_v61 }
 0x129   : > { %2035 = vmatpush.msra.mxu2 %v1450_v37 }
 0x12a   : > { %v1648_v45 = vpop.f32.mrf.mxu1 }
 0x12d   : > { %3644 = vmatmul.msk.f32.gmra.mxu3 %vm1708_vm8, %v4949_v6  ;;  %3637 = vmatmul.msk.f32.gmra.mxu1 %vm1708_vm8, %v4960_v11 }
 0x12e   : > { %3657 = vmatmul.msk.f32.vlgmr.msra.gmra.mxu2 %vm1708_vm8, %v4922_v55  ;;  %v1694_v42 = vpop.f32.mrf.mxu0 }
 0x12f   : > { %v1671_v41 = vpop.f32.mrf.mxu2 }
 0x130   : > { %3651 = vmatmul.msk.f32.gmra.mxu0 %vm1708_vm8, %v4938_v1  ;;  %v1695_v50 = vadd.f32 %v1694_v42, %v1671_v41 }
 0x132   : > { %v1651_v53 = vpop.f32.mrf.mxu1 }
 0x133   : > { %v1625_v46 = vpop.f32.mrf.mxu3 }
 0x134   : > { %v1649_v55 = vadd.f32 %v1648_v45, %v1625_v46 }
 0x135   : > { %3645 = vmatmul.msk.f32.gmra.mxu3 %vm1708_vm8, %v4960_v11  ;;  %3638 = vmatmul.msk.f32.gmra.mxu1 %vm1708_vm8, %v4973_v12 }
 0x136   : > { %3658 = vmatmul.msk.f32.gmra.mxu2 %vm1708_vm8, %v4929_v61  ;;  %v1697_v48 = vpop.f32.mrf.mxu0  ;;  %v2062_v61 = vld [vmem:[%s5783_s4 + $0x8] sm:$0xff] }
 0x137   : > { %v1674_v47 = vpop.f32.mrf.mxu2 }
 0x138   : > { %v1698_v49 = vadd.f32 %v1697_v48, %v1674_v47  ;;  %3652 = vmatmul.msk.f32.gmra.mxu0 %vm1708_vm8, %v4949_v6 }
 0x13a   : > { %2196 = vmatpush.msrb.mxu3 %v1698_v49  ;;  %v5238_v49 = vpop.permute.xlu1 %2104 }
 0x13b   : > { %v1628_v54 = vpop.f32.mrf.mxu3 }
 0x13c   : > { %2197 = vmatpush.msrb.mxu3 %v1695_v50  ;;  %v1652_v56 = vadd.f32 %v1651_v53, %v1628_v54 }
 0x13d   : > { %3646 = vmatmul.msk.f32.gmra.mxu3 %vm1708_vm8, %v4973_v12  ;;  %3639 = vmatmul.msk.f32.gmra.mxu1 %vm1708_vm8, %v4986_v16 }
 0x13e   : > { %3659 = vmatmul.msk.f32.gmra.mxu2 %vm1708_vm8, %v4938_v1  ;;  %2155 = vmatpush.msrb.mxu1 %v1652_v56 }
 0x140   : > { %3653 = vmatmul.msk.f32.gmra.mxu0 %vm1708_vm8, %v4960_v11  ;;  %2156 = vmatpush.msrb.mxu1 %v1649_v55 }
 0x142   : > { %v5248_v55 = vpop.permute.xlu1 %2099 }
 0x145   : > { %3647 = vmatmul.msk.f32.gmra.mxu3 %vm1708_vm8, %v4986_v16  ;;  %3640 = vmatmul.msk.f32.gmra.mxu1 %vm1708_vm8, %v4999_v22 }
 0x146   : > { %3660 = vmatmul.msk.f32.gmra.mxu2 %vm1708_vm8, %v4949_v6  ;;  %v2064_v6 = vld [vmem:[%s5783_s4 + $0x18] sm:$0xff] }
 0x148   : > { %3654 = vmatmul.msk.f32.gmra.mxu0 %vm1708_vm8, %v4973_v12 }
 0x14a   : > { %v5091_v58 = vpop.f32.mrf.mxu1 }
 0x14d   : > { %3648 = vmatmul.msk.f32.gmra.mxu3 %vm1708_vm8, %v4999_v22  ;;  %3665 = vmatmul.msk.f32.vlgmr.msrb.gmra.mxu1 %vm1708_vm8, %v2061_v59 }
 0x14e   : > { %3661 = vmatmul.msk.f32.gmra.mxu2 %vm1708_vm8, %v4960_v11  ;;  %v2421_v11 = vld [vmem:[%s5786_s7 + $0x10] sm:$0xff] }
 0x14f   : > { %2435 = vperm.xlu0 %3768, %v2421_v11  }
 0x150   : > { %3655 = vmatmul.msk.f32.gmra.mxu0 %vm1708_vm8, %v4986_v16 }
 0x152   : > { %v5103_v60 = vpop.f32.mrf.mxu1 }
 0x153   : > { %5821 = vst [vmem:[#allocation6_spill] sm:$0xff] %v5103_v60 }
 0x155   : > { %3673 = vmatmul.msk.f32.vlgmr.msrb.gmra.mxu3 %vm1708_vm8, %v2061_v59  ;;  %3666 = vmatmul.msk.f32.gmra.mxu1 %vm1708_vm8, %v2062_v61 }
 0x156   : > { %3662 = vmatmul.msk.f32.gmra.mxu2 %vm1708_vm8, %v4973_v12 }
 0x157   : > { %v5112_v62 = vpop.f32.mrf.mxu3 }
 0x158   : > { %3656 = vmatmul.msk.f32.gmra.mxu0 %vm1708_vm8, %v4999_v22 }
 0x15a   : > { %v5119_v1 = vpop.f32.mrf.mxu1 }
 0x15b   : > { %5822 = vst [vmem:[#allocation7_spill] sm:$0xff] %v5119_v1 }
 0x15d   : > { %3674 = vmatmul.msk.f32.gmra.mxu3 %vm1708_vm8, %v2062_v61  ;;  %3667 = vmatmul.msk.f32.gmra.mxu1 %vm1708_vm8, %v2063_v2  ;;  %v1832_v15 = vpop.f32.mrf.mxu0 }
 0x15e   : > { %3663 = vmatmul.msk.f32.gmra.mxu2 %vm1708_vm8, %v4986_v16  ;;  %v2721_v16 = vld [vmem:[%s5788_s9] sm:$0xff] }
 0x15f   : > { %v5128_v3 = vpop.f32.mrf.mxu3  ;;  %2724 = vperm.xlu0 %3768, %v2721_v16  }
 0x160   : > { %5823 = vst [vmem:[#allocation8_spill] sm:$0xff] %v5128_v3 }
 0x162   : > { %v5133_v5 = vpop.f32.mrf.mxu1 }
 0x165   : > { %3675 = vmatmul.msk.f32.gmra.mxu3 %vm1708_vm8, %v2063_v2  ;;  %3668 = vmatmul.msk.f32.gmra.mxu1 %vm1708_vm8, %v2064_v6  ;;  %v5180_v21 = vpop.f32.mrf.mxu0  ;;  %v2080_v2 = vpop.permute.xlu1 %2079 }
 0x166   : > { %3664 = vmatmul.msk.f32.gmra.mxu2 %vm1708_vm8, %v4999_v22  ;;  %5825 = vst [vmem:[#allocation10_spill] sm:$0xff] %v5180_v21 }
 0x167   : > { %v5142_v7 = vpop.f32.mrf.mxu3 }
 0x16a   : > { %v5144_v8 = vpop.f32.mrf.mxu1 }
 0x16b   : > { %5824 = vst [vmem:[#allocation9_spill] sm:$0xff] %v5144_v8 }
 0x16d   : > { %3676 = vmatmul.msk.f32.gmra.mxu3 %vm1708_vm8, %v2064_v6  ;;  %3669 = vmatmul.msk.f32.gmra.mxu1 %vm1708_vm8, %v2065_v9  ;;  %v5191_v27 = vpop.f32.mrf.mxu0 }
 0x16f   : > { %v5151_v10 = vpop.f32.mrf.mxu3 }
 0x171   : > { %v1873_v24 = vpop.f32.mrf.mxu2 }
 0x172   : > { %v5156_v12 = vpop.f32.mrf.mxu1 }
 0x175   : > { %3677 = vmatmul.msk.f32.gmra.mxu3 %vm1708_vm8, %v2065_v9  ;;  %3670 = vmatmul.msk.f32.gmra.mxu1 %vm1708_vm8, %v2066_v13  ;;  %v5203_v32 = vpop.f32.mrf.mxu0 }
 0x177   : > { %v5163_v14 = vpop.f32.mrf.mxu3 }
 0x179   : > { %v5194_v28 = vpop.f32.mrf.mxu2 }
 0x17a   : > { %v5168_v17 = vpop.f32.mrf.mxu1  ;;  %5826 = vst [vmem:[#allocation11_spill] sm:$0xff] %v5194_v28 }
 0x17d   : > { %3678 = vmatmul.msk.f32.gmra.mxu3 %vm1708_vm8, %v2066_v13  ;;  %3671 = vmatmul.msk.f32.gmra.mxu1 %vm1708_vm8, %v2067_v18  ;;  %v5214_v38 = vpop.f32.mrf.mxu0 }
 0x17e   : > { %5829 = vst [vmem:[#allocation14_spill] sm:$0xff] %v5214_v38 }
 0x17f   : > { %v5178_v20 = vpop.f32.mrf.mxu3 }
 0x181   : > { %v5208_v35 = vpop.f32.mrf.mxu2 }
 0x182   : > { %v5182_v22 = vpop.f32.mrf.mxu1  ;;  %5827 = vst [vmem:[#allocation12_spill] sm:$0xff] %v5208_v35 }
 0x185   : > { %3679 = vmatmul.msk.f32.gmra.mxu3 %vm1708_vm8, %v2067_v18  ;;  %3672 = vmatmul.msk.f32.gmra.mxu1 %vm1708_vm8, %v2068_v23  ;;  %v5222_v42 = vpop.f32.mrf.mxu0 }
 0x186   : > { %5831 = vst [vmem:[#allocation16_spill] sm:$0xff] %v5222_v42 }
 0x188   : > { %v5189_v25 = vpop.f32.mrf.mxu3 }
 0x189   : > { %v5216_v39 = vpop.f32.mrf.mxu2 }
 0x18a   : > { %v1914_v26 = vpop.f32.mrf.mxu1  ;;  %5830 = vst [vmem:[#allocation15_spill] sm:$0xff] %v5216_v39 }
 0x18b   : > { %v2223_v4 = vadd.f32 %v1914_v26, %v5091_v58  ;;  %v2319_v11 = vadd.f32 %v1914_v26, %v1832_v15 }
 0x18d   : > { %3680 = vmatmul.msk.f32.gmra.mxu3 %vm1708_vm8, %v2068_v23  ;;  %v5232_v47 = vpop.f32.mrf.mxu0 }
 0x18e   : > { %5832 = vst [vmem:[#allocation17_spill] sm:$0xff] %v5232_v47 }
 0x190   : > { %v5196_v29 = vpop.f32.mrf.mxu3 }
 0x191   : > { %v5226_v44 = vpop.f32.mrf.mxu2 }
 0x192   : > { %v5201_v31 = vpop.f32.mrf.mxu1 }
 0x195   : > { %v5244_v53 = vpop.f32.mrf.mxu0 }
 0x196   : > { %5834 = vst [vmem:[#allocation19_spill] sm:$0xff] %v5244_v53 }
 0x198   : > { %v1955_v33 = vpop.f32.mrf.mxu3 }
 0x199   : > { %v5240_v50 = vpop.f32.mrf.mxu2  ;;  %v2224_v26 = vadd.f32 %v1955_v33, %v5112_v62 }
 0x19a   : > { %v5210_v36 = vpop.f32.mrf.mxu1  ;;  %5833 = vst [vmem:[#allocation18_spill] sm:$0xff] %v5240_v50 }
 0x19d   : > { %v1996_v63 = vpop.f32.mrf.mxu0 }
 0x19e   : > { %v2271_v13 = vadd.f32 %v1996_v63, %v5091_v58  ;;  %v2367_v16 = vadd.f32 %v1996_v63, %v1832_v15  ;;  %v2320_v15 = vadd.f32 %v1955_v33, %v1873_v24 }
 0x1a0   : > { %v5212_v37 = vpop.f32.mrf.mxu3 }
 0x1a1   : > { %5828 = vst [vmem:[#allocation13_spill] sm:$0xff] %v5212_v37  ;;  %v5254_v57 = vpop.f32.mrf.mxu2 }
 0x1a2   : > { %v5218_v40 = vpop.f32.mrf.mxu1 }
 0x1a8   : > { %v5220_v41 = vpop.f32.mrf.mxu3 }
 0x1a9   : > { %v5259_v6 = vpop.f32.mrf.mxu2 }
 0x1aa   : > { %v5224_v43 = vpop.f32.mrf.mxu1 }
 0x1b0   : > { %v5228_v45 = vpop.f32.mrf.mxu3 }
 0x1b1   : > { %v2037_v28 = vpop.f32.mrf.mxu2 }
 0x1b2   : > { %v5230_v46 = vpop.f32.mrf.mxu1  ;;  %v2272_v63 = vadd.f32 %v2037_v28, %v5112_v62 }
 0x1b3   : > { %v5236_v48 = vadd.f32 %v5230_v46, %v5222_v42  ;;  %v5274_v42 = vpop.f32.mrf.mxu0 }
 0x1b4   : > { %5839 = vst [vmem:[#allocation24_spill] sm:$0xff] %v5274_v42 }
 0x1b8   : > { %v5242_v51 = vpop.f32.mrf.mxu3 }
 0x1b9   : > { %v5290_v37 = vpop.f32.mrf.mxu2 }
 0x1ba   : > { %v1932_v52 = vpop.f32.mrf.mxu1  ;;  %5846 = vst [vmem:[#allocation31_spill] sm:$0xff] %v5290_v37 }
 0x1c0   : > { %v5246_v54 = vpop.f32.mrf.mxu3 }
 0x1c1   : > { %v5252_v56 = vadd.f32 %v5246_v54, %v5240_v50 }
 0x1c2   : > { %v1935_v59 = vpop.f32.mrf.mxu1 }
 0x1c3   : > { %5835 = vst [vmem:[#allocation20_spill] sm:$0xff] %v5252_v56 }
 0x1c8   : > { %v5256_v61 = vpop.f32.mrf.mxu3 }
 0x1ca   : > { %v2158_v9 = vpop.f32.mrf.mxu1 }
 0x1cb   : > { %v2159_v18 = vadd.f32 %v2158_v9, %v2080_v2 }
 0x1cd   : > { %v5262_v19 = vadd.f32 %v2223_v4, %v2159_v18  ;;  %v5264_v23 = vadd.f32 %v2319_v11, %v2159_v18  ;;  %v5266_v30 = vadd.f32 %v2271_v13, %v2159_v18  ;;  %v5268_v34 = vadd.f32 %v2367_v16, %v2159_v18 }
 0x1ce   : > { %v2368_v4 = vadd.f32 %v2037_v28, %v1873_v24  ;;  %v5296_v24 = vpop.f32.mrf.mxu2 }
 0x1cf   : > { %5836 = vst [vmem:[#allocation21_spill] sm:$0xff] %v5264_v23 }
 0x1d0   : > { %5837 = vst [vmem:[#allocation22_spill] sm:$0xff] %v5266_v30  ;;  %v5270_v0 = vpop.f32.mrf.mxu3  ;;  %v5286_v30 = vpop.f32.mrf.mxu0 }
 0x1d1   : > { %5838 = vst [vmem:[#allocation23_spill] sm:$0xff] %v5268_v34 }
 0x1d2   : > { %v5272_v50 = vpop.f32.mrf.mxu1  ;;  %5844 = vst [vmem:[#allocation29_spill] sm:$0xff] %v5286_v30  ;;  %v2235_v30 = vadd.f32 %v1932_v52, %v5168_v17 }
 0x1d3   : > { %5849 = vst [vmem:[#allocation34_spill] sm:$0xff] %v5296_v24 }
 0x1d8   : > { %v2199_v58 = vpop.f32.mrf.mxu3  ;;  %v5294_v62 = vpop.f32.mrf.mxu0 }
 0x1d9   : > { %v2200_v9 = vadd.f32 %v2199_v58, %v2080_v2  ;;  %5848 = vst [vmem:[#allocation33_spill] sm:$0xff] %v5294_v62 }
 0x1da   : > { %v2164_v34 = vpop.f32.mrf.mxu1 }
 0x1db   : > { %v5278_v11 = vadd.f32 %v2224_v26, %v2200_v9  ;;  %v5280_v13 = vadd.f32 %v2320_v15, %v2200_v9  ;;  %v5282_v16 = vadd.f32 %v2272_v63, %v2200_v9  ;;  %v5284_v18 = vadd.f32 %v2368_v4, %v2200_v9  ;;  %v5302_v15 = vpop.permute.xlu0 %2114  ;;  %v5304_v63 = vpop.f32.mrf.mxu2 }
 0x1dc   : > { %5851 = vst [vmem:[#allocation36_spill] sm:$0xff] %v5304_v63  ;;  %v2237_v63 = vadd.f32 %v1935_v59, %v5182_v22 }
 0x1dd   : > { %5840 = vst [vmem:[#allocation25_spill] sm:$0xff] %v5278_v11 }
 0x1de   : > { %5841 = vst [vmem:[#allocation26_spill] sm:$0xff] %v5280_v13 }
 0x1df   : > { %5842 = vst [vmem:[#allocation27_spill] sm:$0xff] %v5282_v16  ;;  %v5310_v16 = vpop.permute.xlu2 %2094 }
 0x1e0   : > { %5843 = vst [vmem:[#allocation28_spill] sm:$0xff] %v5284_v18  ;;  %v5288_v42 = vpop.f32.mrf.mxu3  ;;  %v5300_v26 = vpop.f32.mrf.mxu0 }
 0x1e1   : > { %5845 = vst [vmem:[#allocation30_spill] sm:$0xff] %v5288_v42  ;;  %v2331_v42 = vadd.f32 %v1932_v52, %v5232_v47  ;;  %v2233_v52 = vadd.f32 %v5230_v46, %v5156_v12  ;;  %v2231_v46 = vadd.f32 %v5224_v43, %v5144_v8  ;;  %v2229_v8 = vadd.f32 %v5218_v40, %v5133_v5 }
 0x1e2   : > { %v2167_v33 = vpop.f32.mrf.mxu1  ;;  %5850 = vst [vmem:[#allocation35_spill] sm:$0xff] %v5300_v26  ;;  %v2333_v26 = vadd.f32 %v1935_v59, %v5244_v53 }
 0x1e3   : > { %v2110_v37 = vpop.permute.xlu0 %2109  ;;  %v5312_v13 = vpop.f32.mrf.mxu2 }
 0x1e4   : > { %5852 = vst [vmem:[#allocation37_spill] sm:$0xff] %v5312_v13  ;;  %v2225_v13 = vadd.f32 %v5201_v31, %v5103_v60 }
 0x1e8   : > { %v5292_v3 = vpop.f32.mrf.mxu3  ;;  %v5308_v18 = vpop.f32.mrf.mxu0 }
 0x1e9   : > { %5847 = vst [vmem:[#allocation32_spill] sm:$0xff] %v5292_v3 }
 0x1ea   : > { %v2170_v28 = vpop.f32.mrf.mxu1 }
 0x1eb   : > { %v5337_v47 = vadd.f32 %v2170_v28, %v5248_v55  ;;  %v2327_v28 = vadd.f32 %v5224_v43, %v5214_v38  ;;  %v2325_v43 = vadd.f32 %v5218_v40, %v5203_v32  ;;  %v5380_v40 = vadd.f32 %v5220_v41, %v5208_v35 }
 0x1ec   : > { %v2234_v35 = vadd.f32 %v5246_v54, %v5178_v20  ;;  %v2334_v54 = vadd.f32 %v5270_v0, %v5259_v6 }
 0x1f0   : > { %v5298_v2 = vpop.f32.mrf.mxu3  ;;  %v5339_v59 = vpop.f32.mrf.mxu0 }
 0x1f2   : > { %v2173_v58 = vpop.f32.mrf.mxu1 }
 0x1f3   : > { %v5323_v39 = vadd.f32 %v2173_v58, %v5238_v49  ;;  %v5341_v58 = vpop.permute.xlu2 %2089 }
 0x1f4   : > { %v5370_v38 = vadd.f32 %v2164_v34, %v5341_v58  ;;  %v5384_v34 = vadd.f32 %v5228_v45, %v5151_v10 }
 0x1f8   : > { %v5306_v4 = vpop.f32.mrf.mxu3 }
 0x1fa   : > { %v2176_v9 = vpop.f32.mrf.mxu1 }
 0x1fb   : > { %v5316_v11 = vadd.f32 %v2176_v9, %v2110_v37  ;;  %v5332_v9 = vadd.f32 %v5201_v31, %v5180_v21  ;;  %v2227_v31 = vadd.f32 %v5210_v36, %v5119_v1  ;;  %v5354_v21 = vadd.f32 %v2167_v33, %v5310_v16  ;;  %v5367_v33 = vpop.f32.mrf.mxu2 }
 0x1fc   : > { %v2323_v1 = vadd.f32 %v5210_v36, %v5191_v27  ;;  %v5376_v36 = vadd.f32 %v5220_v41, %v5142_v7  ;;  %v2232_v41 = vadd.f32 %v5242_v51, %v5163_v14 }
 0x1fd   : > { %v2251_v60 = vadd.f32 %v2235_v30, %v5316_v11  ;;  %v2347_v23 = vadd.f32 %v2331_v42, %v5316_v11  ;;  %v2249_v30 = vadd.f32 %v2233_v52, %v5323_v39  ;;  %v2345_v42 = vadd.f32 %v5236_v48, %v5323_v39 }
 0x1fe   : > { %v2247_v48 = vadd.f32 %v2231_v46, %v5337_v47  ;;  %v2245_v46 = vadd.f32 %v2229_v8, %v5354_v21 }
 0x1ff   : > { %v2363_v52 = vmax.f32 %v2347_v23, 0.0  ;;  %v2361_v23 = vmax.f32 %v2345_v42, 0.0  ;;  %v2339_v42 = vadd.f32 %v2323_v1, %v5370_v38 }
 0x200   : > { %v5314_v24 = vpop.f32.mrf.mxu3  ;;  %v2261_v1 = vmax.f32 %v2245_v46, 0.0 }
 0x202   : > { %v2179_v62 = vpop.f32.mrf.mxu1 }
 0x203   : > { %v5326_v56 = vadd.f32 %v2179_v62, %v5302_v15 }
 0x205   : > { %5853 = vst [vmem:[#allocation38_spill] sm:$0xff] %v5326_v56  ;;  %v2253_v62 = vadd.f32 %v2237_v63, %v5326_v56  ;;  %v2349_v53 = vadd.f32 %v2333_v26, %v5326_v56  ;;  %v5356_v63 = vpop.permute.xlu0 %2084 }
 0x207   : > { %v2269_v26 = vmax.f32 %v2253_v62, 0.0  ;;  %v2365_v56 = vmax.f32 %v2349_v53, 0.0  ;;  %v2267_v53 = vmax.f32 %v2251_v60, 0.0  ;;  %v2343_v62 = vadd.f32 %v2327_v28, %v5337_v47 }
 0x208   : > { %v2217_v3 = vpop.f32.mrf.mxu3  ;;  %v5388_v60 = vadd.f32 %v5272_v50, %v5356_v63  ;;  %v2341_v28 = vadd.f32 %v2325_v43, %v5354_v21  ;;  %v2243_v50 = vadd.f32 %v2227_v31, %v5370_v38  ;;  %v2281_v43 = vadd.f32 %v5308_v18, %v5156_v12 }
 0x209   : > { %2464 = vmatpush.msrb.mxu0 %v2269_v26  ;;  %2580 = vmatpush.msra.mxu1 %v2365_v56  ;;  %v2265_v56 = vmax.f32 %v2249_v30, 0.0  ;;  %v5396_v26 = vadd.f32 %v5242_v51, %v5226_v44  ;;  %v2263_v30 = vmax.f32 %v2247_v48, 0.0  ;;  %v2359_v8 = vmax.f32 %v2343_v62, 0.0 }
 0x20a   : > { %v2236_v51 = vadd.f32 %v5256_v61, %v5189_v25  ;;  %v2357_v48 = vmax.f32 %v2341_v28, 0.0  ;;  %v2241_v12 = vadd.f32 %v2225_v13, %v5388_v60  ;;  %v2332_v62 = vadd.f32 %v5256_v61, %v5254_v57 }
 0x20b   : > { %2465 = vmatpush.msrb.mxu0 %v2267_v53  ;;  %2581 = vmatpush.msra.mxu1 %v2363_v52  ;;  %v5401_v53 = vadd.f32 %v2217_v3, %v2110_v37  ;;  %v2238_v52 = vadd.f32 %v5270_v0, %v5196_v29  ;;  %v5412_v37 = vpop.f32.mrf.mxu0  ;;  %v2259_v0 = vmax.f32 %v2243_v50, 0.0  ;;  %v2283_v61 = vadd.f32 %v5339_v59, %v5168_v17 }
 0x20c   : > { %v2257_v50 = vmax.f32 %v2241_v12, 0.0  ;;  %v5443_v17 = vadd.f32 %v5298_v2, %v5310_v16  ;;  %v5457_v2 = vld [vmem:[%s5785_s6] sm:$0xff] }
 0x20d   : > { %2466 = vmatpush.msrb.mxu0 %v2265_v56  ;;  %2582 = vmatpush.msra.mxu1 %v2361_v23  ;;  %v5422_v56 = vadd.f32 %v5314_v24, %v5238_v49  ;;  %v2337_v23 = vadd.f32 %v5332_v9, %v5388_v60  ;;  %v2252_v13 = vadd.f32 %v2236_v51, %v5401_v53  ;;  %v5433_v24 = vpop.f32.mrf.mxu2  ;;  %v2255_v51 = vmax.f32 %v5262_v19, 0.0  ;;  %v5857_v19 = vld [vmem:[#allocation20_spill] sm:$0xff] }
 0x20e   : > { %v2285_v49 = vadd.f32 %v5412_v37, %v5182_v22  ;;  %v5437_v9 = vadd.f32 %v5306_v4, %v5248_v55  ;;  %v2348_v28 = vadd.f32 %v2332_v62, %v5401_v53  ;;  %v5855_v55 = vld [vmem:[#allocation32_spill] sm:$0xff] }
 0x20f   : > { %2467 = vmatpush.msrb.mxu0 %v2263_v30  ;;  %2583 = vmatpush.msra.mxu1 %v2359_v8  ;;  %v2353_v22 = vmax.f32 %v2337_v23, 0.0  ;;  %v5449_v4 = vadd.f32 %v5855_v55, %v5341_v58  ;;  %v2346_v62 = vadd.f32 %v5857_v19, %v5422_v56  ;;  %v5865_v55 = vld [vmem:[#allocation11_spill] sm:$0xff] }
 0x210   : > { %v2220_v3 = vpop.f32.mrf.mxu3  ;;  %v2364_v16 = vmax.f32 %v2348_v28, 0.0  ;;  %v2248_v58 = vadd.f32 %v2232_v41, %v5437_v9  ;;  %v2246_v41 = vadd.f32 %v5384_v34, %v5443_v17  ;;  %v5866_v19 = vld [vmem:[#allocation7_spill] sm:$0xff] }
 0x211   : > { %v5415_v31 = vadd.f32 %v2220_v3, %v5302_v15  ;;  %2468 = vmatpush.msrb.mxu0 %v2261_v1  ;;  %2584 = vmatpush.msra.mxu1 %v2357_v48  ;;  %v2355_v15 = vmax.f32 %v2339_v42, 0.0  ;;  %v2250_v3 = vadd.f32 %v2234_v35, %v5422_v56  ;;  %v2268_v1 = vmax.f32 %v2252_v13, 0.0  ;;  %v5856_v48 = vld [vmem:[#allocation21_spill] sm:$0xff] }
 0x212   : > { %v2351_v12 = vmax.f32 %v5856_v48, 0.0  ;;  %v2299_v35 = vadd.f32 %v2283_v61, %v5316_v11  ;;  %v2344_v13 = vadd.f32 %v5396_v26, %v5437_v9  ;;  %v5861_v61 = vld [vmem:[#allocation33_spill] sm:$0xff]  ;;  %v2362_v26 = vmax.f32 %v2346_v62, 0.0 }
 0x213   : > { %v2254_v30 = vadd.f32 %v2238_v52, %v5415_v31  ;;  %v2350_v46 = vadd.f32 %v2334_v54, %v5415_v31  ;;  %2469 = vmatpush.msrb.mxu0 %v2259_v0  ;;  %2585 = vmatpush.msra.mxu1 %v2355_v15  ;;  %v5854_v52 = vld [vmem:[#allocation38_spill] sm:$0xff]  ;;  %v5858_v0 = vld [vmem:[#allocation15_spill] sm:$0xff]  ;;  %v5859_v15 = vld [vmem:[#allocation9_spill] sm:$0xff]  ;;  %v2266_v28 = vmax.f32 %v2250_v3, 0.0  ;;  %v2264_v34 = vmax.f32 %v2248_v58, 0.0 }
 0x214   : > { %v2301_v54 = vadd.f32 %v2285_v49, %v5854_v52  ;;  %v2326_v23 = vadd.f32 %v5228_v45, %v5858_v0  ;;  %v2277_v45 = vadd.f32 %v5861_v61, %v5133_v5  ;;  %v2244_v5 = vadd.f32 %v5376_v36, %v5449_v4  ;;  %v5867_v62 = vld [vmem:[#allocation29_spill] sm:$0xff] }
 0x215   : > { %v2270_v8 = vmax.f32 %v2254_v30, 0.0  ;;  %v2366_v42 = vmax.f32 %v2350_v46, 0.0  ;;  %2470 = vmatpush.msrb.mxu0 %v2257_v50  ;;  %2586 = vmatpush.msra.mxu1 %v2353_v22  ;;  %v5860_v30 = vld [vmem:[#allocation35_spill] sm:$0xff]  ;;  %v2297_v50 = vadd.f32 %v2281_v43, %v5323_v39  ;;  %v2315_v43 = vmax.f32 %v2299_v35, 0.0  ;;  %v5492_v35 = vpop.f32.mrf.mxu2 }
 0x216   : > { %v2279_v46 = vadd.f32 %v5860_v30, %v5859_v15  ;;  %v2317_v49 = vmax.f32 %v2301_v54, 0.0  ;;  %v5864_v54 = vld [vmem:[#allocation13_spill] sm:$0xff]  ;;  %v2360_v48 = vmax.f32 %v2344_v13, 0.0  ;;  %v2262_v36 = vmax.f32 %v2246_v41, 0.0 }
 0x217   : > { %2493 = vmatpush.msrb.mxu2 %v2270_v8  ;;  %2609 = vmatpush.msra.mxu3 %v2366_v42  ;;  %v5862_v8 = vld [vmem:[#allocation30_spill] sm:$0xff]  ;;  %v2313_v58 = vmax.f32 %v2297_v50, 0.0 }
 0x218   : > { %2471 = vmatpush.msrb.mxu0 %v2255_v51  ;;  %2587 = vmatpush.msra.mxu1 %v2351_v12  ;;  %v5474_v42 = vadd.f32 %v5862_v8, %v5356_v63  ;;  %v2342_v51 = vadd.f32 %v2326_v23, %v5443_v17  ;;  %v2295_v22 = vadd.f32 %v2279_v46, %v5337_v47  ;;  %v5863_v63 = vld [vmem:[#allocation8_spill] sm:$0xff]  ;;  %v5502_v50 = vld [vmem:[%s5785_s6 + $0x8] sm:$0xff] }
 0x219   : > { %2494 = vmatpush.msrb.mxu2 %v2268_v1  ;;  %2610 = vmatpush.msra.mxu3 %v2364_v16  ;;  %v2226_v3 = vadd.f32 %v5864_v54, %v5863_v63  ;;  %v2322_v1 = vadd.f32 %v5864_v54, %v5865_v55  ;;  %v2340_v12 = vadd.f32 %v5380_v40, %v5449_v4 }
 0x21a   : > { %3681 = vmatmul.msk.f32.vlgmr.msrb.gmra.mxu0 %vm2443_vm3, %v5457_v2  ;;  %3697 = vmatmul.msk.f32.vlgmr.msra.gmra.mxu1 %vm2443_vm3, %v5457_v2  ;;  %v2275_v16 = vadd.f32 %v5867_v62, %v5866_v19  ;;  %v2293_v23 = vadd.f32 %v2277_v45, %v5354_v21  ;;  %v2358_v15 = vmax.f32 %v2342_v51, 0.0  ;;  %v2311_v8 = vmax.f32 %v2295_v22, 0.0 }
 0x21b   : > { %2522 = vmatpush.msra.mxu0 %v2317_v49  ;;  %2495 = vmatpush.msrb.mxu2 %v2266_v28  ;;  %v2242_v46 = vadd.f32 %v2226_v3, %v5474_v42  ;;  %v2338_v13 = vadd.f32 %v2322_v1, %v5474_v42  ;;  %v5868_v49 = vld [vmem:[#allocation6_spill] sm:$0xff]  ;;  %v5869_v28 = vld [vmem:[#allocation24_spill] sm:$0xff]  ;;  %v2286_v45 = vadd.f32 %v5492_v35, %v5196_v29  ;;  %v2356_v51 = vmax.f32 %v2340_v12, 0.0 }
 0x21c   : > { %2611 = vmatpush.msra.mxu3 %v2362_v26  ;;  %v2273_v40 = vadd.f32 %v5869_v28, %v5868_v49  ;;  %v2260_v26 = vmax.f32 %v2244_v5, 0.0  ;;  %v2291_v41 = vadd.f32 %v2275_v16, %v5370_v38  ;;  %v2309_v54 = vmax.f32 %v2293_v23, 0.0 }
 0x21d   : > { %2523 = vmatpush.msra.mxu0 %v2315_v43  ;;  %2496 = vmatpush.msrb.mxu2 %v2264_v34  ;;  %v5870_v43 = vld [vmem:[#allocation19_spill] sm:$0xff]  ;;  %v2284_v5 = vadd.f32 %v5433_v24, %v5189_v25  ;;  %v2258_v3 = vmax.f32 %v2242_v46, 0.0  ;;  %v2354_v1 = vmax.f32 %v2338_v13, 0.0  ;;  %v2302_v29 = vadd.f32 %v2286_v45, %v5415_v31  ;;  %v5872_v25 = vld [vmem:[#allocation25_spill] sm:$0xff]  ;;  %v5874_v46 = vld [vmem:[#allocation16_spill] sm:$0xff] }
 0x21e   : > { %2612 = vmatpush.msra.mxu3 %v2360_v48  ;;  %v2381_v34 = vadd.f32 %v5412_v37, %v5870_v43  ;;  %v2289_v22 = vadd.f32 %v2273_v40, %v5388_v60  ;;  %v5871_v48 = vld [vmem:[#allocation17_spill] sm:$0xff]  ;;  %v2282_v37 = vadd.f32 %v5367_v33, %v5178_v20  ;;  %v2307_v19 = vmax.f32 %v2291_v41, 0.0  ;;  %v5876_v41 = vld [vmem:[#allocation36_spill] sm:$0xff] }
 0x21f   : > { %2524 = vmatpush.msra.mxu0 %v2313_v58  ;;  %2497 = vmatpush.msrb.mxu2 %v2262_v36  ;;  %v2379_v12 = vadd.f32 %v5339_v59, %v5871_v48  ;;  %v2256_v16 = vmax.f32 %v5872_v25, 0.0  ;;  %v5873_v58 = vld [vmem:[#allocation26_spill] sm:$0xff]  ;;  %v2300_v23 = vadd.f32 %v2284_v5, %v5401_v53  ;;  %v2377_v59 = vadd.f32 %v5308_v18, %v5874_v46  ;;  %v5875_v13 = vld [vmem:[#allocation37_spill] sm:$0xff]  ;;  %v5541_v43 = vld [vmem:[%s5785_s6 + $0x10] sm:$0xff] }
 0x220   : > { %2613 = vmatpush.msra.mxu3 %v2358_v15  ;;  %v2352_v36 = vmax.f32 %v5873_v58, 0.0  ;;  %v2397_v15 = vadd.f32 %v2381_v34, %v5854_v52  ;;  %v2305_v20 = vmax.f32 %v2289_v22, 0.0  ;;  %v2280_v49 = vadd.f32 %v5875_v13, %v5163_v14  ;;  %v5877_v18 = vld [vmem:[#allocation22_spill] sm:$0xff] }
 0x221   : > { %2525 = vmatpush.msra.mxu0 %v2311_v8  ;;  %2498 = vmatpush.msrb.mxu2 %v2260_v26  ;;  %v2318_v40 = vmax.f32 %v2302_v29, 0.0  ;;  %v2298_v8 = vadd.f32 %v2282_v37, %v5422_v56  ;;  %v2395_v26 = vadd.f32 %v2379_v12, %v5316_v11  ;;  %v2278_v45 = vadd.f32 %v5876_v41, %v5151_v10  ;;  %v5878_v34 = vld [vmem:[#allocation14_spill] sm:$0xff] }
 0x222   : > { %2614 = vmatpush.msra.mxu3 %v2356_v51  ;;  %3682 = vmatmul.msk.f32.gmra.mxu0 %vm2443_vm3, %v5502_v50  ;;  %v2303_v52 = vmax.f32 %v5877_v18, 0.0  ;;  %v2316_v14 = vmax.f32 %v2300_v23, 0.0  ;;  %v2413_v51 = vmax.f32 %v2397_v15, 0.0  ;;  %v2296_v11 = vadd.f32 %v2280_v49, %v5437_v9  ;;  %v5879_v22 = vld [vmem:[#allocation34_spill] sm:$0xff] }
 0x223   : > { %2526 = vmatpush.msra.mxu0 %v2309_v54  ;;  %3698 = vmatmul.msk.f32.gmra.mxu1 %vm2443_vm3, %v5502_v50  ;;  %v2393_v10 = vadd.f32 %v2377_v59, %v5323_v39  ;;  %v2375_v54 = vadd.f32 %v5860_v30, %v5878_v34  ;;  %v2276_v5 = vadd.f32 %v5879_v22, %v5142_v7  ;;  %v5880_v30 = vld [vmem:[#allocation31_spill] sm:$0xff]  ;;  %v5882_v15 = vld [vmem:[#allocation18_spill] sm:$0xff] }
 0x224   : > { %2499 = vmatpush.msrb.mxu2 %v2258_v3  ;;  %2615 = vmatpush.msra.mxu3 %v2354_v1  ;;  %v2314_v3 = vmax.f32 %v2298_v8, 0.0  ;;  %v2411_v1 = vmax.f32 %v2395_v26, 0.0  ;;  %v2294_v29 = vadd.f32 %v2278_v45, %v5443_v17  ;;  %v2373_v48 = vadd.f32 %v5861_v61, %v5203_v32 }
 0x225   : > { %2527 = vmatpush.msra.mxu0 %v2307_v19  ;;  %v2391_v39 = vadd.f32 %v2375_v54, %v5337_v47  ;;  %v2274_v7 = vadd.f32 %v5880_v30, %v5863_v63  ;;  %v2312_v12 = vmax.f32 %v2296_v11, 0.0  ;;  %v2409_v37 = vmax.f32 %v2393_v10, 0.0  ;;  %v5881_v47 = vld [vmem:[#allocation10_spill] sm:$0xff] }
 0x226   : > { %2500 = vmatpush.msrb.mxu2 %v2256_v16  ;;  %2616 = vmatpush.msra.mxu3 %v2352_v36  ;;  %v2292_v19 = vadd.f32 %v2276_v5, %v5449_v4  ;;  %v2371_v32 = vadd.f32 %v5867_v62, %v5191_v27  ;;  %v2389_v61 = vadd.f32 %v2373_v48, %v5354_v21  ;;  %v2310_v25 = vmax.f32 %v2294_v29, 0.0  ;;  %v5576_v27 = vld [vmem:[%s5785_s6 + $0x18] sm:$0xff] }
 0x227   : > { %3685 = vmatmul.msk.f32.vlgmr.msrb.gmra.mxu2 %vm2443_vm3, %v5457_v2  ;;  %2528 = vmatpush.msra.mxu0 %v2305_v20  ;;  %v2290_v16 = vadd.f32 %v2274_v7, %v5474_v42  ;;  %v2369_v58 = vadd.f32 %v5869_v28, %v5881_v47  ;;  %v2382_v63 = vadd.f32 %v5492_v35, %v5259_v6  ;;  %v2407_v36 = vmax.f32 %v2391_v39, 0.0  ;;  %v5651_v39 = vpop.permute.xlu1 %2430 }
 0x228   : > { %2551 = vmatpush.msra.mxu2 %v2318_v40  ;;  %3701 = vmatmul.msk.f32.vlgmr.msra.gmra.mxu3 %vm2443_vm3, %v5457_v2  ;;  %v2387_v23 = vadd.f32 %v2371_v32, %v5370_v38  ;;  %v2308_v21 = vmax.f32 %v2292_v19, 0.0  ;;  %v2380_v62 = vadd.f32 %v5433_v24, %v5254_v57  ;;  %v2405_v6 = vmax.f32 %v2389_v61, 0.0  ;;  %v5883_v57 = vld [vmem:[#allocation27_spill] sm:$0xff] }
 0x229   : > { %2529 = vmatpush.msra.mxu0 %v2303_v52  ;;  %v2385_v35 = vadd.f32 %v2369_v58, %v5388_v60  ;;  %v2398_v28 = vadd.f32 %v2382_v63, %v5415_v31  ;;  %v2306_v38 = vmax.f32 %v2290_v16, 0.0  ;;  %v2378_v46 = vadd.f32 %v5367_v33, %v5882_v15 }
 0x22a   : > { %2552 = vmatpush.msra.mxu2 %v2316_v14  ;;  %3683 = vmatmul.msk.f32.gmra.mxu0 %vm2443_vm3, %v5541_v43  ;;  %v2403_v59 = vmax.f32 %v2387_v23, 0.0  ;;  %v2396_v20 = vadd.f32 %v2380_v62, %v5401_v53  ;;  %v2304_v60 = vmax.f32 %v5883_v57, 0.0  ;;  %v2376_v31 = vadd.f32 %v5875_v13, %v5226_v44  ;;  %v5884_v53 = vld [vmem:[#allocation23_spill] sm:$0xff]  ;;  %v5885_v44 = vld [vmem:[#allocation12_spill] sm:$0xff] }
 0x22b   : > { %2638 = vmatpush.msrb.mxu0 %v2413_v51  ;;  %3699 = vmatmul.msk.f32.gmra.mxu1 %vm2443_vm3, %v5541_v43  ;;  %v2401_v24 = vmax.f32 %v2385_v35, 0.0  ;;  %v2414_v49 = vmax.f32 %v2398_v28, 0.0  ;;  %v2394_v33 = vadd.f32 %v2378_v46, %v5422_v56  ;;  %v2374_v40 = vadd.f32 %v5876_v41, %v5858_v0 }
 0x22c   : > { %2553 = vmatpush.msra.mxu2 %v2314_v3  ;;  %v2399_v8 = vmax.f32 %v5884_v53, 0.0  ;;  %v2412_v26 = vmax.f32 %v2396_v20, 0.0  ;;  %v2392_v45 = vadd.f32 %v2376_v31, %v5437_v9  ;;  %v2372_v56 = vadd.f32 %v5879_v22, %v5885_v44  ;;  %v5645_v22 = vpop.permute.xlu2 %2440 }
 0x22d   : > { %2639 = vmatpush.msrb.mxu0 %v2411_v1  ;;  %v2410_v13 = vmax.f32 %v2394_v33, 0.0  ;;  %v2390_v0 = vadd.f32 %v2374_v40, %v5443_v17  ;;  %v2370_v41 = vadd.f32 %v5880_v30, %v5865_v55  ;;  %v5886_v55 = vld [vmem:[#allocation28_spill] sm:$0xff] }
 0x22e   : > { %2554 = vmatpush.msra.mxu2 %v2312_v12  ;;  %v2408_v18 = vmax.f32 %v2392_v45, 0.0  ;;  %v2388_v9 = vadd.f32 %v2372_v56, %v5449_v4  ;;  %v2400_v4 = vmax.f32 %v5886_v55, 0.0 }
 0x22f   : > { %2640 = vmatpush.msrb.mxu0 %v2409_v37  ;;  %3686 = vmatmul.msk.f32.gmra.mxu2 %vm2443_vm3, %v5502_v50  ;;  %v2406_v52 = vmax.f32 %v2390_v0, 0.0  ;;  %v2386_v14 = vadd.f32 %v2370_v41, %v5474_v42 }
 0x230   : > { %2555 = vmatpush.msra.mxu2 %v2310_v25  ;;  %3702 = vmatmul.msk.f32.gmra.mxu3 %vm2443_vm3, %v5502_v50  ;;  %v2404_v51 = vmax.f32 %v2388_v9, 0.0 }
 0x231   : > { %2641 = vmatpush.msrb.mxu0 %v2407_v36  ;;  %v2402_v17 = vmax.f32 %v2386_v14, 0.0 }
 0x232   : > { %2556 = vmatpush.msra.mxu2 %v2308_v21  ;;  %3684 = vmatmul.msk.f32.gmra.mxu0 %vm2443_vm3, %v5576_v27 }
 0x233   : > { %2642 = vmatpush.msrb.mxu0 %v2405_v6  ;;  %3700 = vmatmul.msk.f32.gmra.mxu1 %vm2443_vm3, %v5576_v27  ;;  %v5664_v6 = vld [vmem:[%s5787_s8] sm:$0xff] }
 0x234   : > { %2557 = vmatpush.msra.mxu2 %v2306_v38  ;;  %v5656_v61 = vpop.permute.xlu2 %2425 }
 0x235   : > { %2643 = vmatpush.msrb.mxu0 %v2403_v59 }
 0x236   : > { %2558 = vmatpush.msra.mxu2 %v2304_v60 }
 0x237   : > { %2644 = vmatpush.msrb.mxu0 %v2401_v24  ;;  %3687 = vmatmul.msk.f32.gmra.mxu2 %vm2443_vm3, %v5541_v43 }
 0x238   : > { %2667 = vmatpush.msrb.mxu2 %v2414_v49  ;;  %3703 = vmatmul.msk.f32.gmra.mxu3 %vm2443_vm3, %v5541_v43 }
 0x239   : > { %2645 = vmatpush.msrb.mxu0 %v2399_v8 }
 0x23a   : > { %2668 = vmatpush.msrb.mxu2 %v2412_v26  ;;  %3689 = vmatmul.msk.f32.vlgmr.msra.gmra.mxu0 %vm2443_vm3, %v5457_v2 }
 0x23c   : > { %2669 = vmatpush.msrb.mxu2 %v2410_v13 }
 0x23e   : > { %2670 = vmatpush.msrb.mxu2 %v2408_v18 }
 0x23f   : > { %3688 = vmatmul.msk.f32.gmra.mxu2 %vm2443_vm3, %v5576_v27 }
 0x240   : > { %2671 = vmatpush.msrb.mxu2 %v2406_v52  ;;  %3704 = vmatmul.msk.f32.gmra.mxu3 %vm2443_vm3, %v5576_v27 }
 0x242   : > { %2672 = vmatpush.msrb.mxu2 %v2404_v51  ;;  %3690 = vmatmul.msk.f32.gmra.mxu0 %vm2443_vm3, %v5502_v50 }
 0x244   : > { %2673 = vmatpush.msrb.mxu2 %v2402_v17 }
 0x246   : > { %2674 = vmatpush.msrb.mxu2 %v2400_v4 }
 0x247   : > { %3693 = vmatmul.msk.f32.vlgmr.msra.gmra.mxu2 %vm2443_vm3, %v5457_v2 }
 0x24a   : > { %3691 = vmatmul.msk.f32.gmra.mxu0 %vm2443_vm3, %v5541_v43 }
 0x24f   : > { %3694 = vmatmul.msk.f32.gmra.mxu2 %vm2443_vm3, %v5502_v50 }
 0x252   : > { %3692 = vmatmul.msk.f32.gmra.mxu0 %vm2443_vm3, %v5576_v27 }
 0x257   : > { %3695 = vmatmul.msk.f32.gmra.mxu2 %vm2443_vm3, %v5541_v43 }
 0x25a   : > { %3705 = vmatmul.msk.f32.vlgmr.msrb.gmra.mxu0 %vm2443_vm3, %v5457_v2 }
 0x25f   : > { %3696 = vmatmul.msk.f32.gmra.mxu2 %vm2443_vm3, %v5576_v27 }
 0x262   : > { %3706 = vmatmul.msk.f32.gmra.mxu0 %vm2443_vm3, %v5502_v50 }
 0x267   : > { %3709 = vmatmul.msk.f32.vlgmr.msrb.gmra.mxu2 %vm2443_vm3, %v5457_v2 }
 0x26a   : > { %3707 = vmatmul.msk.f32.gmra.mxu0 %vm2443_vm3, %v5541_v43 }
 0x26f   : > { %3710 = vmatmul.msk.f32.gmra.mxu2 %vm2443_vm3, %v5502_v50  ;;  %v5647_v50 = vpop.permute.xlu0 %2435 }
 0x272   : > { %3708 = vmatmul.msk.f32.gmra.mxu0 %vm2443_vm3, %v5576_v27 }
 0x277   : > { %3711 = vmatmul.msk.f32.gmra.mxu2 %vm2443_vm3, %v5541_v43 }
 0x27f   : > { %3712 = vmatmul.msk.f32.gmra.mxu2 %vm2443_vm3, %v5576_v27 }
 0x297   : > { %v2473_v42 = vpop.f32.mrf.mxu0  ;;  %v2589_v11 = vpop.f32.mrf.mxu1 }
 0x298   : > { %v2590_v47 = vadd.f32 %v2589_v11, %v5656_v61  ;;  %v2474_v63 = vadd.f32 %v2473_v42, %v5656_v61 }
 0x29a   : > { %v2692_v27 = vmax.f32 %v2590_v47, 0.0  ;;  %v2688_v35 = vmax.f32 %v2474_v63, 0.0 }
 0x29f   : > { %v2476_v10 = vpop.f32.mrf.mxu0 }
 0x2a0   : > { %v2592_v34 = vpop.f32.mrf.mxu1  ;;  %v2477_v25 = vadd.f32 %v2476_v10, %v5651_v39 }
 0x2a1   : > { %v2593_v37 = vadd.f32 %v2592_v34, %v5651_v39 }
 0x2a2   : > { %v2696_v21 = vmax.f32 %v2477_v25, 0.0 }
 0x2a3   : > { %v2700_v23 = vmax.f32 %v2593_v37, 0.0 }
 0x2a7   : > { %v2479_v2 = vpop.f32.mrf.mxu0 }
 0x2a8   : > { %v2595_v54 = vpop.f32.mrf.mxu1  ;;  %v2480_v30 = vadd.f32 %v2479_v2, %v5647_v50 }
 0x2a9   : > { %v2596_v29 = vadd.f32 %v2595_v54, %v5647_v50 }
 0x2aa   : > { %v2502_v5 = vpop.f32.mrf.mxu2  ;;  %v2704_v36 = vmax.f32 %v2480_v30, 0.0 }
 0x2ab   : > { %v2618_v3 = vpop.f32.mrf.mxu3  ;;  %v2708_v58 = vmax.f32 %v2596_v29, 0.0  ;;  %v2503_v53 = vadd.f32 %v2502_v5, %v5656_v61 }
 0x2ac   : > { %v2619_v8 = vadd.f32 %v2618_v3, %v5656_v61 }
 0x2ad   : > { %v2689_v41 = vmax.f32 %v2503_v53, 0.0 }
 0x2ae   : > { %v2693_v18 = vmax.f32 %v2619_v8, 0.0  ;;  %v2899_v8 = vld [vmem:[%s5789_s10] sm:$0xff] }
 0x2af   : > { %v2482_v48 = vpop.f32.mrf.mxu0 }
 0x2b0   : > { %v2598_v1 = vpop.f32.mrf.mxu1  ;;  %v2483_v7 = vadd.f32 %v2482_v48, %v5645_v22 }
 0x2b1   : > { %v2599_v43 = vadd.f32 %v2598_v1, %v5645_v22 }
 0x2b2   : > { %v2505_v12 = vpop.f32.mrf.mxu2  ;;  %v2712_v16 = vmax.f32 %v2483_v7, 0.0 }
 0x2b3   : > { %v2716_v19 = vmax.f32 %v2599_v43, 0.0  ;;  %v2621_v32 = vpop.f32.mrf.mxu3  ;;  %v2506_v24 = vadd.f32 %v2505_v12, %v5651_v39 }
 0x2b4   : > { %2743 = vmatpush.msrb.mxu1 %v2712_v16  ;;  %v2622_v49 = vadd.f32 %v2621_v32, %v5651_v39 }
 0x2b5   : > { %2823 = vmatpush.msra.mxu0 %v2716_v19  ;;  %v2697_v56 = vmax.f32 %v2506_v24, 0.0 }
 0x2b6   : > { %2744 = vmatpush.msrb.mxu1 %v2704_v36  ;;  %v2701_v13 = vmax.f32 %v2622_v49, 0.0 }
 0x2b7   : > { %2824 = vmatpush.msra.mxu0 %v2708_v58  ;;  %v2531_v62 = vpop.f32.mrf.mxu0 }
 0x2b8   : > { %2745 = vmatpush.msrb.mxu1 %v2696_v21  ;;  %v2532_v4 = vadd.f32 %v2531_v62, %v5656_v61 }
 0x2b9   : > { %2825 = vmatpush.msra.mxu0 %v2700_v23 }
 0x2ba   : > { %v2508_v28 = vpop.f32.mrf.mxu2  ;;  %2746 = vmatpush.msrb.mxu1 %v2688_v35  ;;  %v2690_v34 = vmax.f32 %v2532_v4, 0.0 }
 0x2bb   : > { %v2624_v38 = vpop.f32.mrf.mxu3  ;;  %2826 = vmatpush.msra.mxu0 %v2692_v27  ;;  %3713 = vmatmul.msk.f32.vlgmr.msrb.gmra.mxu1 %vm2727_vm9, %v5664_v6  ;;  %v2509_v20 = vadd.f32 %v2508_v28, %v5647_v50 }
 0x2bc   : > { %3717 = vmatmul.msk.f32.vlgmr.msra.gmra.mxu0 %vm2727_vm9, %v5664_v6  ;;  %v2625_v57 = vadd.f32 %v2624_v38, %v5647_v50 }
 0x2bd   : > { %v2705_v26 = vmax.f32 %v2509_v20, 0.0 }
 0x2be   : > { %v2709_v45 = vmax.f32 %v2625_v57, 0.0 }
 0x2bf   : > { %v2534_v15 = vpop.f32.mrf.mxu0 }
 0x2c0   : > { %v2535_v17 = vadd.f32 %v2534_v15, %v5651_v39 }
 0x2c2   : > { %v2511_v46 = vpop.f32.mrf.mxu2  ;;  %v2698_v11 = vmax.f32 %v2535_v17, 0.0 }
 0x2c3   : > { %v2627_v59 = vpop.f32.mrf.mxu3  ;;  %v2512_v60 = vadd.f32 %v2511_v46, %v5645_v22 }
 0x2c4   : > { %v2628_v31 = vadd.f32 %v2627_v59, %v5645_v22 }
 0x2c5   : > { %v2713_v33 = vmax.f32 %v2512_v60, 0.0 }
 0x2c6   : > { %v2717_v40 = vmax.f32 %v2628_v31, 0.0 }
 0x2c7   : > { %2763 = vmatpush.msrb.mxu3 %v2713_v33  ;;  %v2537_v44 = vpop.f32.mrf.mxu0 }
 0x2c8   : > { %2843 = vmatpush.msra.mxu2 %v2717_v40  ;;  %v2538_v52 = vadd.f32 %v2537_v44, %v5647_v50  ;;  %v2903_v44 = vld [vmem:[%s5789_s10 + $0x20] sm:$0xff] }
 0x2c9   : > { %2764 = vmatpush.msrb.mxu3 %v2705_v26 }
 0x2ca   : > { %2844 = vmatpush.msra.mxu2 %v2709_v45  ;;  %v2560_v0 = vpop.f32.mrf.mxu2  ;;  %v2706_v42 = vmax.f32 %v2538_v52, 0.0 }
 0x2cb   : > { %2765 = vmatpush.msrb.mxu3 %v2697_v56  ;;  %v2561_v43 = vadd.f32 %v2560_v0, %v5656_v61 }
 0x2cc   : > { %2845 = vmatpush.msra.mxu2 %v2701_v13 }
 0x2cd   : > { %2766 = vmatpush.msrb.mxu3 %v2689_v41  ;;  %v2691_v19 = vmax.f32 %v2561_v43, 0.0  ;;  %v2900_v43 = vld [vmem:[%s5789_s10 + $0x8] sm:$0xff] }
 0x2ce   : > { %2846 = vmatpush.msra.mxu2 %v2693_v18  ;;  %3714 = vmatmul.msk.f32.vlgmr.msrb.gmra.mxu3 %vm2727_vm9, %v5664_v6  ;;  %v2905_v18 = vld [vmem:[%s5789_s10 + $0x30] sm:$0xff] }
 0x2cf   : > { %3718 = vmatmul.msk.f32.vlgmr.msra.gmra.mxu2 %vm2727_vm9, %v5664_v6  ;;  %v2540_v9 = vpop.f32.mrf.mxu0 }
 0x2d0   : > { %v2541_v14 = vadd.f32 %v2540_v9, %v5645_v22 }
 0x2d2   : > { %v2563_v51 = vpop.f32.mrf.mxu2  ;;  %v2714_v55 = vmax.f32 %v2541_v14, 0.0 }
 0x2d3   : > { %v2564_v29 = vadd.f32 %v2563_v51, %v5651_v39 }
 0x2d4   : > { %2783 = vmatpush.msra.mxu1 %v2714_v55 }
 0x2d5   : > { %v2699_v12 = vmax.f32 %v2564_v29, 0.0 }
 0x2d6   : > { %2784 = vmatpush.msra.mxu1 %v2706_v42 }
 0x2d7   : > { %v2647_v10 = vpop.f32.mrf.mxu0 }
 0x2d8   : > { %2785 = vmatpush.msra.mxu1 %v2698_v11  ;;  %v2648_v36 = vadd.f32 %v2647_v10, %v5656_v61 }
 0x2da   : > { %v2566_v2 = vpop.f32.mrf.mxu2  ;;  %2786 = vmatpush.msra.mxu1 %v2690_v34  ;;  %v2694_v27 = vmax.f32 %v2648_v36, 0.0 }
 0x2db   : > { %3715 = vmatmul.msk.f32.vlgmr.msra.gmra.mxu1 %vm2727_vm9, %v5664_v6  ;;  %v2567_v3 = vadd.f32 %v2566_v2, %v5647_v50 }
 0x2dd   : > { %v2707_v30 = vmax.f32 %v2567_v3, 0.0  ;;  %v2902_v3 = vld [vmem:[%s5789_s10 + $0x18] sm:$0xff] }
 0x2df   : > { %v2650_v54 = vpop.f32.mrf.mxu0 }
 0x2e0   : > { %v2651_v58 = vadd.f32 %v2650_v54, %v5651_v39 }
 0x2e2   : > { %v2569_v5 = vpop.f32.mrf.mxu2  ;;  %v2702_v21 = vmax.f32 %v2651_v58, 0.0  ;;  %v2906_v58 = vld [vmem:[%s5789_s10 + $0x38] sm:$0xff] }
 0x2e3   : > { %v2570_v1 = vadd.f32 %v2569_v5, %v5645_v22 }
 0x2e5   : > { %v2715_v48 = vmax.f32 %v2570_v1, 0.0 }
 0x2e7   : > { %2803 = vmatpush.msra.mxu3 %v2715_v48  ;;  %v2653_v7 = vpop.f32.mrf.mxu0 }
 0x2e8   : > { %v2654_v25 = vadd.f32 %v2653_v7, %v5647_v50 }
 0x2e9   : > { %2804 = vmatpush.msra.mxu3 %v2707_v30 }
 0x2ea   : > { %v2676_v37 = vpop.f32.mrf.mxu2  ;;  %v2710_v23 = vmax.f32 %v2654_v25, 0.0 }
 0x2eb   : > { %2805 = vmatpush.msra.mxu3 %v2699_v12  ;;  %v2677_v59 = vadd.f32 %v2676_v37, %v5656_v61  ;;  %v2901_v61 = vld [vmem:[%s5789_s10 + $0x10] sm:$0xff] }
 0x2ed   : > { %2806 = vmatpush.msra.mxu3 %v2691_v19  ;;  %v2695_v60 = vmax.f32 %v2677_v59, 0.0  ;;  %v2904_v19 = vld [vmem:[%s5789_s10 + $0x28] sm:$0xff] }
 0x2ee   : > { %3716 = vmatmul.msk.f32.vlgmr.msra.gmra.mxu3 %vm2727_vm9, %v5664_v6 }
 0x2ef   : > { %v2656_v32 = vpop.f32.mrf.mxu0 }
 0x2f0   : > { %v2657_v16 = vadd.f32 %v2656_v32, %v5645_v22  ;;  %v2934_v32 = vstv %s5718_s20  ;;  %s5736_s20 = sshll.u32 %s420_s19, 1 }
 0x2f1   : > { %s422_s17 = scalar_lea.vmem [#allocation3], %s5736_s20 }
 0x2f2   : > { %v2679_v47 = vpop.f32.mrf.mxu2  ;;  %v2718_v63 = vmax.f32 %v2657_v16, 0.0  ;;  %s2999_s27 = sshll.u32 %s422_s17, 4  ;;  %s3000_s27 = int_to_ptr.vmem [resolvable:$true] %s2999_s27 }
 0x2f3   : > { %v2680_v15 = vadd.f32 %v2679_v47, %v5651_v39 }
 0x2f4   : > { %2863 = vmatpush.msrb.mxu1 %v2718_v63 }
 0x2f5   : > { %v2703_v57 = vmax.f32 %v2680_v15, 0.0 }
 0x2f6   : > { %2864 = vmatpush.msrb.mxu1 %v2710_v23 }
 0x2f8   : > { %2865 = vmatpush.msrb.mxu1 %v2702_v21 }
 0x2fa   : > { %v2682_v62 = vpop.f32.mrf.mxu2  ;;  %2866 = vmatpush.msrb.mxu1 %v2694_v27 }
 0x2fb   : > { %3719 = vmatmul.msk.f32.vlgmr.msrb.gmra.mxu1 %vm2727_vm9, %v5664_v6  ;;  %v2683_v28 = vadd.f32 %v2682_v62, %v5647_v50  ;;  %v2725_v50 = vpop.permute.xlu0 %2724 }
 0x2fd   : > { %v2711_v20 = vmax.f32 %v2683_v28, 0.0 }
 0x302   : > { %v2685_v35 = vpop.f32.mrf.mxu2 }
 0x303   : > { %v2686_v38 = vadd.f32 %v2685_v35, %v5645_v22 }
 0x305   : > { %v2719_v46 = vmax.f32 %v2686_v38, 0.0 }
 0x307   : > { %2883 = vmatpush.msrb.mxu3 %v2719_v46 }
 0x309   : > { %2884 = vmatpush.msrb.mxu3 %v2711_v20 }
 0x30b   : > { %2885 = vmatpush.msrb.mxu3 %v2703_v57 }
 0x30d   : > { %2886 = vmatpush.msrb.mxu3 %v2695_v60 }
 0x30e   : > { %3720 = vmatmul.msk.f32.vlgmr.msrb.gmra.mxu3 %vm2727_vm9, %v5664_v6 }
 0x338   : > { %v2748_v31 = vpop.f32.mrf.mxu1 }
 0x339   : > { %v2749_v22 = vadd.f32 %v2748_v31, %v2725_v50  ;;  %v2828_v33 = vpop.f32.mrf.mxu0 }
 0x33a   : > { %v2829_v53 = vadd.f32 %v2828_v33, %v2725_v50 }
 0x33b   : > { %v2891_v40 = vmax.f32 %v2749_v22, 0.0 }
 0x33c   : > { %v2895_v6 = vmax.f32 %v2829_v53, 0.0 }
 0x33d   : > { %v2907_v45 = vmul.f32 %v2899_v8, %v2891_v40 }
 0x33e   : > { %v2911_v9 = vmul.f32 %v2903_v44, %v2895_v6 }
 0x351   : > { %v2768_v41 = vpop.f32.mrf.mxu3 }
 0x352   : > { %v2769_v34 = vadd.f32 %v2768_v41, %v2725_v50  ;;  %v2848_v54 = vpop.f32.mrf.mxu2 }
 0x353   : > { %v2849_v29 = vadd.f32 %v2848_v54, %v2725_v50 }
 0x354   : > { %v2892_v1 = vmax.f32 %v2769_v34, 0.0 }
 0x355   : > { %v2896_v12 = vmax.f32 %v2849_v29, 0.0 }
 0x356   : > { %v2908_v7 = vmul.f32 %v2900_v43, %v2892_v1 }
 0x357   : > { %v2912_v63 = vmul.f32 %v2904_v19, %v2896_v12 }
 0x358   : > { %v2788_v24 = vpop.f32.mrf.mxu1 }
 0x359   : > { %v2789_v49 = vadd.f32 %v2788_v24, %v2725_v50 }
 0x35b   : > { %v2893_v39 = vmax.f32 %v2789_v49, 0.0 }
 0x35d   : > { %v2909_v26 = vmul.f32 %v2901_v61, %v2893_v39 }
 0x35f   : > { %v2915_v13 = vadd.f32 %v2909_v26, %v2907_v45 }
 0x361   : > { %v2917_v51 = vadd.f32 %v2915_v13, %v2911_v9 }
 0x371   : > { %v2808_v4 = vpop.f32.mrf.mxu3 }
 0x372   : > { %v2809_v11 = vadd.f32 %v2808_v4, %v2725_v50 }
 0x374   : > { %v2894_v5 = vmax.f32 %v2809_v11, 0.0 }
 0x376   : > { %v2910_v30 = vmul.f32 %v2902_v3, %v2894_v5 }
 0x378   : > { %v2868_v56 = vpop.f32.mrf.mxu1  ;;  %v2916_v16 = vadd.f32 %v2910_v30, %v2908_v7 }
 0x379   : > { %v2869_v0 = vadd.f32 %v2868_v56, %v2725_v50 }
 0x37a   : > { %v2918_v27 = vadd.f32 %v2916_v16, %v2912_v63 }
 0x37b   : > { %v2897_v52 = vmax.f32 %v2869_v0, 0.0 }
 0x37d   : > { %v2913_v14 = vmul.f32 %v2905_v18, %v2897_v52 }
 0x37f   : > { %v2919_v17 = vadd.f32 %v2917_v51, %v2913_v14 }
 0x381   : > { %v2921_v55 = vrot.slane %v2919_v17, 4 }
 0x383   : > { %v2922_v42 = vadd.f32 %v2921_v55, %v2919_v17  ;;  %v5889_v55 = vlaneseq }
 0x385   : > { %v2923_v10 = vrot.slane %v2922_v42, 2  ;;  %vm2983_vm4 = vcmp.lt.s32.totalorder %v5889_v55, 256 }
 0x387   : > { %v2924_v2 = vadd.f32 %v2923_v10, %v2922_v42 }
 0x389   : > { %v2925_v48 = vrot.slane %v2924_v2, 1 }
 0x38b   : > { %v2926_v37 = vadd.f32 %v2925_v48, %v2924_v2 }
 0x38d   : > { %v2935_v36 = vadd.f32 %v2934_v32, %v2926_v37 }
 0x38f   : > { %v3721_v62 = vmul.f32 -1.442695, %v2935_v36 }
 0x391   : > { %v2888_v25 = vpop.f32.mrf.mxu3  ;;  %3771 = vpow2.f32 %v3721_v62 }
 0x392   : > { %v2889_v47 = vadd.f32 %v2888_v25, %v2725_v50 }
 0x394   : > { %v2898_v23 = vmax.f32 %v2889_v47, 0.0 }
 0x396   : > { %v2914_v21 = vmul.f32 %v2906_v58, %v2898_v23 }
 0x397   : > { %v3772_v59 = vpop.eup %3771 }
 0x398   : > { %v2920_v35 = vadd.f32 %v2918_v27, %v2914_v21  ;;  %v2943_v60 = vadd.f32 1.0, %v3772_v59 }
 0x39a   : > { %v2927_v28 = vrot.slane %v2920_v35, 4  ;;  %3773 = vrcp.f32 %v2943_v60  ;;  %vm2950_vm12 = vweird.f32 %v2943_v60  ;;  %v2956_v56 = vand.u32 2147483648, %v2943_v60 }
 0x39b   : > { %v2954_v0 = vand.u32 2147483647, %v2943_v60 }
 0x39c   : > { %v2928_v38 = vadd.f32 %v2927_v28, %v2920_v35  ;;  %v2957_v14 = vor.u32 1.1754944e-38, %v2956_v56 }
 0x39d   : > { %vm2955_vm2 = vcmp.eq.f32.partialorder %v2954_v0, 8.507059e+37 }
 0x39e   : > { %v2929_v15 = vrot.slane %v2928_v38, 2 }
 0x3a0   : > { %v2930_v46 = vadd.f32 %v2929_v15, %v2928_v38  ;;  %v3774_v50 = vpop.eup %3773 }
 0x3a1   : > { %v2946_v33 = vmul.f32 %v3774_v50, %v2943_v60  ;;  %vm2951_vm10 = vweird.f32 %v3774_v50 }
 0x3a2   : > { %v2931_v20 = vrot.slane %v2930_v46, 1  ;;  %vm5742_vm13 = vmor %vm2950_vm12, %vm2951_vm10 }
 0x3a3   : > { %v2947_v39 = vsub.f32 1.0, %v2946_v33 }
 0x3a4   : > { %v2932_v57 = vadd.f32 %v2931_v20, %v2930_v46 }
 0x3a5   : > { %v2948_v40 = vmul.f32 %v3774_v50, %v2947_v39 }
 0x3a6   : > { %v2936_v31 = vadd.f32 %v2934_v32, %v2932_v57 }
 0x3a7   : > { %v2949_v45 = vadd.f32 %v3774_v50, %v2948_v40 }
 0x3a8   : > { %v3722_v24 = vmul.f32 -1.442695, %v2936_v31 }
 0x3a9   : > { %v2953_v9 = vsel %vm5742_vm13, %v3774_v50, %v2949_v45 }
 0x3aa   : > { %3775 = vpow2.f32 %v3722_v24  ;;  %v2958_v4 = vsel %vm2955_vm2, %v2957_v14, %v2953_v9 }
 0x3b0   : > { %v3776_v49 = vpop.eup %3775 }
 0x3b1   : > { %v2944_v22 = vadd.f32 1.0, %v3776_v49 }
 0x3b3   : > { %3777 = vrcp.f32 %v2944_v22  ;;  %v2971_v26 = vand.u32 2147483648, %v2944_v22  ;;  %v2969_v44 = vand.u32 2147483647, %v2944_v22  ;;  %vm2965_vm14 = vweird.f32 %v2944_v22 }
 0x3b5   : > { %v2972_v18 = vor.u32 1.1754944e-38, %v2971_v26  ;;  %vm2970_vm0 = vcmp.eq.f32.partialorder %v2969_v44, 8.507059e+37 }
 0x3b9   : > { %v3778_v61 = vpop.eup %3777 }
 0x3ba   : > { %v2961_v53 = vmul.f32 %v3778_v61, %v2944_v22  ;;  %vm2966_vm11 = vweird.f32 %v3778_v61 }
 0x3bb   : > { %vm2967_vm15 = vmor %vm2965_vm14, %vm2966_vm11 }
 0x3bc   : > { %v2962_v8 = vsub.f32 1.0, %v2961_v53 }
 0x3be   : > { %v2963_v6 = vmul.f32 %v3778_v61, %v2962_v8 }
 0x3c0   : > { %v2964_v41 = vadd.f32 %v3778_v61, %v2963_v6 }
 0x3c2   : > { %v2968_v52 = vsel %vm2967_vm15, %v3778_v61, %v2964_v41 }
 0x3c3   : > { %v2973_v51 = vsel %vm2970_vm0, %v2972_v18, %v2968_v52 }
 0x3c4   : > { %v2977_v17 = vrot.slane %v2973_v51, 7 }
 0x3c6   : > { %v2979_v42 = vsel %vm2978_vm1, %v2958_v4, %v2977_v17 }
 0x3c7   : > { %2985 = vst.msk [vmem:[%s422_s17] sm:$0x3] %vm2983_vm4, %v2979_v42 }
 0x3c8   : > { %3806 = shalt.err (!%p3803_p3)
}
 0x3c9   : > { %3727 = dma.vmem_to_hbm [thread:$0]  (%p3948_p5), %s3000_s27, 32, %s3002_s29, %s2987_s16  }
 0x3ca PF: > { %p3733_p4 = scmp.ge.s32.totalorder %s3841_s26, 2  ;;  %s3013_s19 = sand.u32 1, %s3829_s23  }
 0x3cb   : > { %s3014_s17 = scalar_lea.sflag [#allocation4], %s3013_s19 }
 0x3cc   : > { %p3730_p7 = pnand %p3733_p4, %p3952_p6 }
 0x3ce   : > { %p3731_p8 = pneg %p3730_p7 }
 0x3d0   : > { %3824 = dma.done.wait (%p3731_p8), %s3014_s17, 32  }
 0x3d1   : > { %3826 = vsyncadd (%p3731_p8), %s3014_s17, 4294967264  ;;  %p23_p9 = scmp.ge.s32.totalorder %s3936_s28, 4   ;;  %s5890_s23 = smov %s3833_s24 }
 0x3d2   : > { %s5891_s24 = smov %s3837_s25  ;;  %s5892_s25 = smov %s3946_s13 }
 0x3d3   : > { %s5893_s26 = smov %s3936_s28  ;;  %25 = sbr.rel (!%p23_p9) target bundleno = 6 (0x6), region = 109 }
 0x3d8   :  { %3020 = vsyncpa [#allocation4], 1 }
 0x3d9   :  { %3022 = vsyncpa [#allocation4 + $0x1], 1 }

</bundles_post_ra>
